<compile_context>
chip_gen: v6e
topology: v6e:2x2x1
jax: 0.10.0
libtpu: 0.0.40
codegen_flags: <defaults>
</compile_context>

<pallas_src>
import numpy as np
import jax
import jax.numpy as jnp
from jax.experimental import pallas as pl
from jax.experimental.pallas import tpu as pltpu

H1, H2, H3, H4 = 256, 64, 32, 16
_LANE = 128

_SELU_ALPHA = 1.6732632423543772
_SELU_SCALE = 1.0507009873554805


def _selu(x):
    # exp(min(x,0)) keeps the EUP input bounded; the where masks the x>0 branch.
    return _SELU_SCALE * jnp.where(
        x > 0, x, _SELU_ALPHA * (jnp.exp(jnp.minimum(x, 0.0)) - 1.0))


def _sigmoid(x):
    return 1.0 / (1.0 + jnp.exp(-x))


# fc_encoder1: Linear dims as (out, in); Dropout -> identity in eval mode.
_ENC1_DIMS = [(H4, 3), (H3, H4), (H2, H3), (H1, H2),
              (H2, H1), (H3, H2), (H4, H3), (1, H4)]
_ACTS1 = (_selu, _selu, None, _selu, _selu, _selu, _selu, _sigmoid)

# fc_encoder2: Linear dims as (in, out) (applied to a (1, 256) row vector).
_ENC2_DIMS = [(H1, H2), (H2, H3), (H3, H4), (H4, 1)]
_ACTS2 = (_selu, _selu, _selu, _sigmoid)


def _round_up(v, m):
    return ((v + m - 1) // m) * m


def _col_offsets(widths):
    offs, c = [], 0
    for w in widths:
        offs.append(c)
        c += _round_up(w, _LANE)
    return offs, c


# 128-lane-aligned column offsets of each layer inside the packed slabs.
_ENC1_COLS, _ENC1_TOTAL = _col_offsets([fi for _, fi in _ENC1_DIMS])   # -> 1152 cols
_ENC2_COLS, _ENC2_TOTAL = _col_offsets([fo for _, fo in _ENC2_DIMS])   # -> 512 cols


# --------------------------------------------------------------------------
# Kernel
# --------------------------------------------------------------------------
def jarvis_kernel(x_ref, p_ref, w1_ref, b1_ref, w2_ref, b2_ref, out_ref, acc_ref):
    n = pl.program_id(1)

    @pl.when(n == 0)
    def _init():
        acc_ref[...] = jnp.zeros_like(acc_ref)

    # ---- fc_encoder1: lane-dense (features, points) layout ----------------
    h = x_ref[0].astype(jnp.float32)                       # (3, N_TILE)
    for l, ((fo, fi), col, act) in enumerate(zip(_ENC1_DIMS, _ENC1_COLS, _ACTS1)):
        w = w1_ref[0:fo, col:col + fi]                     # (fo, fi), static slice
        b = b1_ref[0:fo, l:l + 1]                          # (fo, 1)
        h = jnp.dot(w, h, preferred_element_type=jnp.float32) + b
        if act is not None:
            h = act(h)
    # h: (1, N_TILE) -- per-point sigmoid output.

    # ---- adaptive-avg-pool partial sum on the MXU --------------------------
    acc_ref[...] += jnp.dot(h, p_ref[...], preferred_element_type=jnp.float32)

    # ---- epilogue: fc_encoder2 on the pooled (1, 256) vector ---------------
    @pl.when(n == pl.num_programs(1) - 1)
    def _finish():
        z = acc_ref[...]                                   # (1, 256)
        for m, ((fi, fo), col, act) in enumerate(zip(_ENC2_DIMS, _ENC2_COLS, _ACTS2)):
            w = w2_ref[0:fi, col:col + fo]                 # (fi, fo)
            b = b2_ref[m:m + 1, 0:fo]                      # (1, fo)
            z = act(jnp.dot(z, w, preferred_element_type=jnp.float32) + b)
        out_ref[0] = z                                     # (1, 1) block of (B,1,1)


# --------------------------------------------------------------------------
# Host-side helpers
# --------------------------------------------------------------------------
def adaptive_avg_pool_matrix(length, out_size):
    """Dense matrix equivalent of nn.AdaptiveAvgPool1d(out_size) on length L."""
    p = np.zeros((length, out_size), dtype=np.float32)
    for i in range(out_size):
        s = (i * length) // out_size
        e = -((-(i + 1) * length) // out_size)             # ceil((i+1)*L/out)
        p[s:e, i] = 1.0 / (e - s)
    return jnp.asarray(p)


def pack_params(enc1_w, enc1_b, enc2_w, enc2_b):
    """Pack the 24 Linear params into 4 lane-aligned slabs.

    enc*_w[l] use PyTorch layout (out, in); enc*_b[l] are (out,).
    """
    w1 = np.zeros((H1, _ENC1_TOTAL), np.float32)
    b1 = np.zeros((H1, len(_ENC1_DIMS)), np.float32)
    for l, ((fo, fi), col) in enumerate(zip(_ENC1_DIMS, _ENC1_COLS)):
        w1[:fo, col:col + fi] = np.asarray(enc1_w[l])
        b1[:fo, l] = np.asarray(enc1_b[l])

    w2 = np.zeros((H1, _ENC2_TOTAL), np.float32)
    b2 = np.zeros((len(_ENC2_DIMS), _LANE), np.float32)
    for m, ((fi, fo), col) in enumerate(zip(_ENC2_DIMS, _ENC2_COLS)):
        w2[:fi, col:col + fo] = np.asarray(enc2_w[m]).T    # (out,in) -> (in,out)
        b2[m, :fo] = np.asarray(enc2_b[m])

    return jnp.asarray(w1), jnp.asarray(b1), jnp.asarray(w2), jnp.asarray(b2)


def init_linear(key, fan_in, fan_out):
    """PyTorch default init: uniform(-1/sqrt(fan_in), 1/sqrt(fan_in))."""
    kw, kb = jax.random.split(key)
    bound = 1.0 / np.sqrt(fan_in)
    w = jax.random.uniform(kw, (fan_out, fan_in), jnp.float32, -bound, bound)
    b = jax.random.uniform(kb, (fan_out,), jnp.float32, -bound, bound)
    return w, b


def init_params(key):
    keys = jax.random.split(key, len(_ENC1_DIMS) + len(_ENC2_DIMS))
    enc1_w, enc1_b, enc2_w, enc2_b = [], [], [], []
    for k, (fo, fi) in zip(keys[:len(_ENC1_DIMS)], _ENC1_DIMS):
        w, b = init_linear(k, fi, fo)
        enc1_w.append(w); enc1_b.append(b)
    for k, (fi, fo) in zip(keys[len(_ENC1_DIMS):], _ENC2_DIMS):
        w, b = init_linear(k, fi, fo)
        enc2_w.append(w); enc2_b.append(b)
    return enc1_w, enc1_b, enc2_w, enc2_b


def jarvis_forward(x, w1, b1, w2, b2, pool_mat, *, n_tile=None):
    """x: (B, N, 3) float32 -> (B, 1, 1)."""
    B, N, F = x.shape
    assert F == 3
    if n_tile is None:
        n_tile = N if N <= 1024 else 1024
    assert N % n_tile == 0
    assert n_tile == N or n_tile % _LANE == 0
    n_steps = N // n_tile

    # Layout plumbing: put points on the 128-lane axis.
    x_t = jnp.transpose(x, (0, 2, 1))                      # (B, 3, N)

    return pl.pallas_call(
        jarvis_kernel,
        out_shape=jax.ShapeDtypeStruct((B, 1, 1), jnp.float32),
        grid=(B, n_steps),
        in_specs=[
            pl.BlockSpec((1, 3, n_tile), lambda b, n: (b, 0, n)),
            pl.BlockSpec((n_tile, H1), lambda b, n: (n, 0)),
            pl.BlockSpec(w1.shape, lambda b, n: (0, 0)),   # resident param slabs
            pl.BlockSpec(b1.shape, lambda b, n: (0, 0)),
            pl.BlockSpec(w2.shape, lambda b, n: (0, 0)),
            pl.BlockSpec(b2.shape, lambda b, n: (0, 0)),
        ],
        out_specs=pl.BlockSpec((1, 1, 1), lambda b, n: (b, 0, 0)),
        scratch_shapes=[pltpu.VMEM((1, H1), jnp.float32)],  # pooled accumulator
        compiler_params=pltpu.CompilerParams(
            dimension_semantics=("parallel", "arbitrary"),
            vmem_limit_bytes=32 * 1024 * 1024),
    )(x_t, pool_mat, w1, b1, w2, b2)


def jarvis_reference(x, enc1_w, enc1_b, enc2_w, enc2_b, pool_mat):
    """Pure-JAX reference (same math as the PyTorch module in eval mode)."""
    h = x.astype(jnp.float32)                               # (B, N, 3)
    for l, act in enumerate(_ACTS1):
        h = jnp.einsum("bnf,of->bno", h, enc1_w[l]) + enc1_b[l]
        if act is not None:
            h = act(h)
    pooled = jnp.einsum("bn,nk->bk", h[..., 0], pool_mat)[:, None, :]   # (B,1,256)
    z = pooled
    for m, act in enumerate(_ACTS2):
        z = jnp.einsum("bnf,of->bno", z, enc2_w[m]) + enc2_b[m]
        z = act(z)
    return jnp.transpose(z, (0, 2, 1))                      # (B, 1, 1)


if __name__ == "__main__":
    B, N = 2, 512
    key = jax.random.PRNGKey(0)
    kx, kp = jax.random.split(key)

    x = jax.random.normal(kx, (B, N, 3), dtype=jnp.float32)
    enc1_w, enc1_b, enc2_w, enc2_b = init_params(kp)
    w1, b1, w2, b2 = pack_params(enc1_w, enc1_b, enc2_w, enc2_b)
    pool_mat = adaptive_avg_pool_matrix(N, H1)

    # n_tile=128 exercises the tiled (multi-step) accumulation path.
    out = jax.block_until_ready(
        jarvis_forward(x, w1, b1, w2, b2, pool_mat, n_tile=128))
    ref = jax.block_until_ready(
        jarvis_reference(x, enc1_w, enc1_b, enc2_w, enc2_b, pool_mat))

    np.testing.assert_allclose(np.asarray(out), np.asarray(ref),
                               rtol=1e-5, atol=1e-5)
    assert out.shape == (B, 1, 1)

    print("KERNEL_OK")
</pallas_src>

<mosaic_0001>
module attributes {stable_mosaic.version = 11 : i64} {
  func.func @jarvis_kernel(%arg0: i32, %arg1: i32, %arg2: memref<1x3x128xf32, #tpu.memory_space<vmem>>, %arg3: memref<128x256xf32, #tpu.memory_space<vmem>>, %arg4: memref<256x1152xf32, #tpu.memory_space<vmem>>, %arg5: memref<256x8xf32, #tpu.memory_space<vmem>>, %arg6: memref<256x512xf32, #tpu.memory_space<vmem>>, %arg7: memref<4x128xf32, #tpu.memory_space<vmem>>, %arg8: memref<1x1x1xf32, #tpu.memory_space<vmem>>, %arg9: memref<1x256xf32, #tpu.memory_space<vmem>>) attributes {dimension_semantics = [#tpu.dimension_semantics<parallel>, #tpu.dimension_semantics<arbitrary>], iteration_bounds = array<i64: 2, 4>, scalar_prefetch = 0 : i64, scratch_operands = 1 : i64, tpu.core_type = #tpu.core_type<tc>, window_params = [{transform_indices = @transform_0, window_bounds = array<i64: 1, 3, 128>}, {transform_indices = @transform_1, window_bounds = array<i64: 128, 256>}, {pipeline_mode = #tpu.pipeline_mode<synchronous>, transform_indices = @transform_2, window_bounds = array<i64: 256, 1152>}, {pipeline_mode = #tpu.pipeline_mode<synchronous>, transform_indices = @transform_3, window_bounds = array<i64: 256, 8>}, {pipeline_mode = #tpu.pipeline_mode<synchronous>, transform_indices = @transform_4, window_bounds = array<i64: 256, 512>}, {pipeline_mode = #tpu.pipeline_mode<synchronous>, transform_indices = @transform_5, window_bounds = array<i64: 4, 128>}, {transform_indices = @transform_6, window_bounds = array<i64: 1, 1, 1>}]} {
    %c0_i32 = arith.constant 0 : i32
    %0 = arith.cmpi eq, %arg1, %c0_i32 : i32
    %1 = arith.extui %0 : i1 to i32
    %c0_i32_0 = arith.constant 0 : i32
    %2 = arith.cmpi ne, %1, %c0_i32_0 : i32
    scf.if %2 {
      %cst_69 = arith.constant 0.000000e+00 : f32
      %132 = vector.broadcast %cst_69 : f32 to vector<1x256xf32>
      %c0_70 = arith.constant 0 : index
      %c0_71 = arith.constant 0 : index
      %133 = vector.load %arg9[%c0_70, %c0_71] : memref<1x256xf32, #tpu.memory_space<vmem>>, vector<1x256xf32>
      tpu.vector_store %arg9[%c0_70, %c0_71], %132 {strides = array<i32>} : memref<1x256xf32, #tpu.memory_space<vmem>>, vector<1x256xf32>,
    } else {
    }
    %c0 = arith.constant 0 : index
    %c0_1 = arith.constant 0 : index
    %c0_2 = arith.constant 0 : index
    %3 = vector.load %arg2[%c0, %c0_1, %c0_2] : memref<1x3x128xf32, #tpu.memory_space<vmem>>, vector<1x3x128xf32>
    %4 = vector.shape_cast %3 : vector<1x3x128xf32> to vector<3x128xf32>
    %c0_3 = arith.constant 0 : index
    %c0_4 = arith.constant 0 : index
    %5 = vector.load %arg4[%c0_3, %c0_4] : memref<256x1152xf32, #tpu.memory_space<vmem>>, vector<16x3xf32>
    %c0_5 = arith.constant 0 : index
    %c0_6 = arith.constant 0 : index
    %6 = vector.load %arg5[%c0_5, %c0_6] : memref<256x8xf32, #tpu.memory_space<vmem>>, vector<16x1xf32>
    %cst = arith.constant dense<0.000000e+00> : vector<16x128xf32>
    %7 = tpu.matmul %5, %4, %cst {dimension_numbers = #tpu.dot_dimension_numbers<[1], [0], [0], [1], [0, 0, 1, 1], [], []>} : vector<16x3xf32>, vector<3x128xf32>, vector<16x128xf32> -> vector<16x128xf32>
    %8 = vector.broadcast %6 : vector<16x1xf32> to vector<16x128xf32>
    %9 = arith.addf %7, %8 : vector<16x128xf32>
    %cst_7 = arith.constant 0.000000e+00 : f32
    %10 = vector.broadcast %cst_7 : f32 to vector<16x128xf32>
    %11 = arith.cmpf ogt, %9, %10 : vector<16x128xf32>
    %cst_8 = arith.constant 0.000000e+00 : f32
    %12 = vector.broadcast %cst_8 : f32 to vector<16x128xf32>
    %13 = arith.minimumf %9, %12 : vector<16x128xf32>
    %14 = math.exp %13 : vector<16x128xf32>
    %cst_9 = arith.constant 1.000000e+00 : f32
    %15 = vector.broadcast %cst_9 : f32 to vector<16x128xf32>
    %16 = arith.subf %14, %15 : vector<16x128xf32>
    %cst_10 = arith.constant 1.67326319 : f32
    %17 = vector.broadcast %cst_10 : f32 to vector<16x128xf32>
    %18 = arith.mulf %17, %16 : vector<16x128xf32>
    %19 = arith.select %11, %9, %18 : vector<16x128xi1>, vector<16x128xf32>
    %cst_11 = arith.constant 1.05070102 : f32
    %20 = vector.broadcast %cst_11 : f32 to vector<16x128xf32>
    %21 = arith.mulf %20, %19 : vector<16x128xf32>
    %c0_12 = arith.constant 0 : index
    %c128 = arith.constant 128 : index
    %22 = vector.load %arg4[%c0_12, %c128] : memref<256x1152xf32, #tpu.memory_space<vmem>>, vector<32x16xf32>
    %c0_13 = arith.constant 0 : index
    %c1 = arith.constant 1 : index
    %23 = vector.load %arg5[%c0_13, %c1] : memref<256x8xf32, #tpu.memory_space<vmem>>, vector<32x1xf32>
    %cst_14 = arith.constant dense<0.000000e+00> : vector<32x128xf32>
    %24 = tpu.matmul %22, %21, %cst_14 {dimension_numbers = #tpu.dot_dimension_numbers<[1], [0], [0], [1], [0, 0, 1, 1], [], []>} : vector<32x16xf32>, vector<16x128xf32>, vector<32x128xf32> -> vector<32x128xf32>
    %25 = vector.broadcast %23 : vector<32x1xf32> to vector<32x128xf32>
    %26 = arith.addf %24, %25 : vector<32x128xf32>
    %cst_15 = arith.constant 0.000000e+00 : f32
    %27 = vector.broadcast %cst_15 : f32 to vector<32x128xf32>
    %28 = arith.cmpf ogt, %26, %27 : vector<32x128xf32>
    %cst_16 = arith.constant 0.000000e+00 : f32
    %29 = vector.broadcast %cst_16 : f32 to vector<32x128xf32>
    %30 = arith.minimumf %26, %29 : vector<32x128xf32>
    %31 = math.exp %30 : vector<32x128xf32>
    %cst_17 = arith.constant 1.000000e+00 : f32
    %32 = vector.broadcast %cst_17 : f32 to vector<32x128xf32>
    %33 = arith.subf %31, %32 : vector<32x128xf32>
    %cst_18 = arith.constant 1.67326319 : f32
    %34 = vector.broadcast %cst_18 : f32 to vector<32x128xf32>
    %35 = arith.mulf %34, %33 : vector<32x128xf32>
    %36 = arith.select %28, %26, %35 : vector<32x128xi1>, vector<32x128xf32>
    %cst_19 = arith.constant 1.05070102 : f32
    %37 = vector.broadcast %cst_19 : f32 to vector<32x128xf32>
    %38 = arith.mulf %37, %36 : vector<32x128xf32>
    %c0_20 = arith.constant 0 : index
    %c256 = arith.constant 256 : index
    %39 = vector.load %arg4[%c0_20, %c256] : memref<256x1152xf32, #tpu.memory_space<vmem>>, vector<64x32xf32>
    %c0_21 = arith.constant 0 : index
    %c2 = arith.constant 2 : index
    %40 = vector.load %arg5[%c0_21, %c2] : memref<256x8xf32, #tpu.memory_space<vmem>>, vector<64x1xf32>
    %cst_22 = arith.constant dense<0.000000e+00> : vector<64x128xf32>
    %41 = tpu.matmul %39, %38, %cst_22 {dimension_numbers = #tpu.dot_dimension_numbers<[1], [0], [0], [1], [0, 0, 1, 1], [], []>} : vector<64x32xf32>, vector<32x128xf32>, vector<64x128xf32> -> vector<64x128xf32>
    %42 = vector.broadcast %40 : vector<64x1xf32> to vector<64x128xf32>
    %43 = arith.addf %41, %42 : vector<64x128xf32>
    %c0_23 = arith.constant 0 : index
    %c384 = arith.constant 384 : index
    %44 = vector.load %arg4[%c0_23, %c384] : memref<256x1152xf32, #tpu.memory_space<vmem>>, vector<256x64xf32>
    %c0_24 = arith.constant 0 : index
    %c3 = arith.constant 3 : index
    %45 = vector.load %arg5[%c0_24, %c3] : memref<256x8xf32, #tpu.memory_space<vmem>>, vector<256x1xf32>
    %cst_25 = arith.constant dense<0.000000e+00> : vector<256x128xf32>
    %46 = tpu.matmul %44, %43, %cst_25 {dimension_numbers = #tpu.dot_dimension_numbers<[1], [0], [0], [1], [0, 0, 1, 1], [], []>} : vector<256x64xf32>, vector<64x128xf32>, vector<256x128xf32> -> vector<256x128xf32>
    %47 = vector.broadcast %45 : vector<256x1xf32> to vector<256x128xf32>
    %48 = arith.addf %46, %47 : vector<256x128xf32>
    %cst_26 = arith.constant 0.000000e+00 : f32
    %49 = vector.broadcast %cst_26 : f32 to vector<256x128xf32>
    %50 = arith.cmpf ogt, %48, %49 : vector<256x128xf32>
    %cst_27 = arith.constant 0.000000e+00 : f32
    %51 = vector.broadcast %cst_27 : f32 to vector<256x128xf32>
    %52 = arith.minimumf %48, %51 : vector<256x128xf32>
    %53 = math.exp %52 : vector<256x128xf32>
    %cst_28 = arith.constant 1.000000e+00 : f32
    %54 = vector.broadcast %cst_28 : f32 to vector<256x128xf32>
    %55 = arith.subf %53, %54 : vector<256x128xf32>
    %cst_29 = arith.constant 1.67326319 : f32
    %56 = vector.broadcast %cst_29 : f32 to vector<256x128xf32>
    %57 = arith.mulf %56, %55 : vector<256x128xf32>
    %58 = arith.select %50, %48, %57 : vector<256x128xi1>, vector<256x128xf32>
    %cst_30 = arith.constant 1.05070102 : f32
    %59 = vector.broadcast %cst_30 : f32 to vector<256x128xf32>
    %60 = arith.mulf %59, %58 : vector<256x128xf32>
    %c0_31 = arith.constant 0 : index
    %c512 = arith.constant 512 : index
    %61 = vector.load %arg4[%c0_31, %c512] : memref<256x1152xf32, #tpu.memory_space<vmem>>, vector<64x256xf32>
    %c0_32 = arith.constant 0 : index
    %c4 = arith.constant 4 : index
    %62 = vector.load %arg5[%c0_32, %c4] : memref<256x8xf32, #tpu.memory_space<vmem>>, vector<64x1xf32>
    %cst_33 = arith.constant dense<0.000000e+00> : vector<64x128xf32>
    %63 = tpu.matmul %61, %60, %cst_33 {dimension_numbers = #tpu.dot_dimension_numbers<[1], [0], [0], [1], [0, 0, 1, 1], [], []>} : vector<64x256xf32>, vector<256x128xf32>, vector<64x128xf32> -> vector<64x128xf32>
    %64 = vector.broadcast %62 : vector<64x1xf32> to vector<64x128xf32>
    %65 = arith.addf %63, %64 : vector<64x128xf32>
    %cst_34 = arith.constant 0.000000e+00 : f32
    %66 = vector.broadcast %cst_34 : f32 to vector<64x128xf32>
    %67 = arith.cmpf ogt, %65, %66 : vector<64x128xf32>
    %cst_35 = arith.constant 0.000000e+00 : f32
    %68 = vector.broadcast %cst_35 : f32 to vector<64x128xf32>
    %69 = arith.minimumf %65, %68 : vector<64x128xf32>
    %70 = math.exp %69 : vector<64x128xf32>
    %cst_36 = arith.constant 1.000000e+00 : f32
    %71 = vector.broadcast %cst_36 : f32 to vector<64x128xf32>
    %72 = arith.subf %70, %71 : vector<64x128xf32>
    %cst_37 = arith.constant 1.67326319 : f32
    %73 = vector.broadcast %cst_37 : f32 to vector<64x128xf32>
    %74 = arith.mulf %73, %72 : vector<64x128xf32>
    %75 = arith.select %67, %65, %74 : vector<64x128xi1>, vector<64x128xf32>
    %cst_38 = arith.constant 1.05070102 : f32
    %76 = vector.broadcast %cst_38 : f32 to vector<64x128xf32>
    %77 = arith.mulf %76, %75 : vector<64x128xf32>
    %c0_39 = arith.constant 0 : index
    %c768 = arith.constant 768 : index
    %78 = vector.load %arg4[%c0_39, %c768] : memref<256x1152xf32, #tpu.memory_space<vmem>>, vector<32x64xf32>
    %c0_40 = arith.constant 0 : index
    %c5 = arith.constant 5 : index
    %79 = vector.load %arg5[%c0_40, %c5] : memref<256x8xf32, #tpu.memory_space<vmem>>, vector<32x1xf32>
    %cst_41 = arith.constant dense<0.000000e+00> : vector<32x128xf32>
    %80 = tpu.matmul %78, %77, %cst_41 {dimension_numbers = #tpu.dot_dimension_numbers<[1], [0], [0], [1], [0, 0, 1, 1], [], []>} : vector<32x64xf32>, vector<64x128xf32>, vector<32x128xf32> -> vector<32x128xf32>
    %81 = vector.broadcast %79 : vector<32x1xf32> to vector<32x128xf32>
    %82 = arith.addf %80, %81 : vector<32x128xf32>
    %cst_42 = arith.constant 0.000000e+00 : f32
    %83 = vector.broadcast %cst_42 : f32 to vector<32x128xf32>
    %84 = arith.cmpf ogt, %82, %83 : vector<32x128xf32>
    %cst_43 = arith.constant 0.000000e+00 : f32
    %85 = vector.broadcast %cst_43 : f32 to vector<32x128xf32>
    %86 = arith.minimumf %82, %85 : vector<32x128xf32>
    %87 = math.exp %86 : vector<32x128xf32>
    %cst_44 = arith.constant 1.000000e+00 : f32
    %88 = vector.broadcast %cst_44 : f32 to vector<32x128xf32>
    %89 = arith.subf %87, %88 : vector<32x128xf32>
    %cst_45 = arith.constant 1.67326319 : f32
    %90 = vector.broadcast %cst_45 : f32 to vector<32x128xf32>
    %91 = arith.mulf %90, %89 : vector<32x128xf32>
    %92 = arith.select %84, %82, %91 : vector<32x128xi1>, vector<32x128xf32>
    %cst_46 = arith.constant 1.05070102 : f32
    %93 = vector.broadcast %cst_46 : f32 to vector<32x128xf32>
    %94 = arith.mulf %93, %92 : vector<32x128xf32>
    %c0_47 = arith.constant 0 : index
    %c896 = arith.constant 896 : index
    %95 = vector.load %arg4[%c0_47, %c896] : memref<256x1152xf32, #tpu.memory_space<vmem>>, vector<16x32xf32>
    %c0_48 = arith.constant 0 : index
    %c6 = arith.constant 6 : index
    %96 = vector.load %arg5[%c0_48, %c6] : memref<256x8xf32, #tpu.memory_space<vmem>>, vector<16x1xf32>
    %cst_49 = arith.constant dense<0.000000e+00> : vector<16x128xf32>
    %97 = tpu.matmul %95, %94, %cst_49 {dimension_numbers = #tpu.dot_dimension_numbers<[1], [0], [0], [1], [0, 0, 1, 1], [], []>} : vector<16x32xf32>, vector<32x128xf32>, vector<16x128xf32> -> vector<16x128xf32>
    %98 = vector.broadcast %96 : vector<16x1xf32> to vector<16x128xf32>
    %99 = arith.addf %97, %98 : vector<16x128xf32>
    %cst_50 = arith.constant 0.000000e+00 : f32
    %100 = vector.broadcast %cst_50 : f32 to vector<16x128xf32>
    %101 = arith.cmpf ogt, %99, %100 : vector<16x128xf32>
    %cst_51 = arith.constant 0.000000e+00 : f32
    %102 = vector.broadcast %cst_51 : f32 to vector<16x128xf32>
    %103 = arith.minimumf %99, %102 : vector<16x128xf32>
    %104 = math.exp %103 : vector<16x128xf32>
    %cst_52 = arith.constant 1.000000e+00 : f32
    %105 = vector.broadcast %cst_52 : f32 to vector<16x128xf32>
    %106 = arith.subf %104, %105 : vector<16x128xf32>
    %cst_53 = arith.constant 1.67326319 : f32
    %107 = vector.broadcast %cst_53 : f32 to vector<16x128xf32>
    %108 = arith.mulf %107, %106 : vector<16x128xf32>
    %109 = arith.select %101, %99, %108 : vector<16x128xi1>, vector<16x128xf32>
    %cst_54 = arith.constant 1.05070102 : f32
    %110 = vector.broadcast %cst_54 : f32 to vector<16x128xf32>
    %111 = arith.mulf %110, %109 : vector<16x128xf32>
    %c0_55 = arith.constant 0 : index
    %c1024 = arith.constant 1024 : index
    %112 = vector.load %arg4[%c0_55, %c1024] : memref<256x1152xf32, #tpu.memory_space<vmem>>, vector<1x16xf32>
    %c0_56 = arith.constant 0 : index
    %c7 = arith.constant 7 : index
    %113 = vector.load %arg5[%c0_56, %c7] : memref<256x8xf32, #tpu.memory_space<vmem>>, vector<1x1xf32>
    %cst_57 = arith.constant dense<0.000000e+00> : vector<1x128xf32>
    %114 = tpu.matmul %112, %111, %cst_57 {dimension_numbers = #tpu.dot_dimension_numbers<[1], [0], [0], [1], [0, 0, 1, 1], [], []>} : vector<1x16xf32>, vector<16x128xf32>, vector<1x128xf32> -> vector<1x128xf32>
    %115 = vector.broadcast %113 : vector<1x1xf32> to vector<1x128xf32>
    %116 = arith.addf %114, %115 : vector<1x128xf32>
    %cst_58 = arith.constant 0.000000e+00 : f32
    %117 = vector.broadcast %cst_58 : f32 to vector<1x128xf32>
    %118 = arith.subf %117, %116 : vector<1x128xf32>
    %119 = math.exp %118 : vector<1x128xf32>
    %cst_59 = arith.constant 1.000000e+00 : f32
    %120 = vector.broadcast %cst_59 : f32 to vector<1x128xf32>
    %121 = arith.addf %120, %119 : vector<1x128xf32>
    %cst_60 = arith.constant 1.000000e+00 : f32
    %122 = vector.broadcast %cst_60 : f32 to vector<1x128xf32>
    %123 = arith.divf %122, %121 : vector<1x128xf32>
    %c0_61 = arith.constant 0 : index
    %c0_62 = arith.constant 0 : index
    %124 = vector.load %arg9[%c0_61, %c0_62] : memref<1x256xf32, #tpu.memory_space<vmem>>, vector<1x256xf32>
    %c0_63 = arith.constant 0 : index
    %c0_64 = arith.constant 0 : index
    %125 = vector.load %arg3[%c0_63, %c0_64] : memref<128x256xf32, #tpu.memory_space<vmem>>, vector<128x256xf32>
    %cst_65 = arith.constant dense<0.000000e+00> : vector<1x256xf32>
    %126 = tpu.matmul %123, %125, %cst_65 {dimension_numbers = #tpu.dot_dimension_numbers<[1], [0], [0], [1], [0, 0, 1, 1], [], []>} : vector<1x128xf32>, vector<128x256xf32>, vector<1x256xf32> -> vector<1x256xf32>
    %127 = arith.addf %124, %126 : vector<1x256xf32>
    %c0_66 = arith.constant 0 : index
    %c0_67 = arith.constant 0 : index
    %128 = vector.load %arg9[%c0_66, %c0_67] : memref<1x256xf32, #tpu.memory_space<vmem>>, vector<1x256xf32>
    tpu.vector_store %arg9[%c0_66, %c0_67], %127 {strides = array<i32>} : memref<1x256xf32, #tpu.memory_space<vmem>>, vector<1x256xf32>,
    %c3_i32 = arith.constant 3 : i32
    %129 = arith.cmpi eq, %arg1, %c3_i32 : i32
    %130 = arith.extui %129 : i1 to i32
    %c0_i32_68 = arith.constant 0 : i32
    %131 = arith.cmpi ne, %130, %c0_i32_68 : i32
    scf.if %131 {
      %c0_69 = arith.constant 0 : index
      %c0_70 = arith.constant 0 : index
      %132 = vector.load %arg9[%c0_69, %c0_70] : memref<1x256xf32, #tpu.memory_space<vmem>>, vector<1x256xf32>
      %c0_71 = arith.constant 0 : index
      %c0_72 = arith.constant 0 : index
      %133 = vector.load %arg6[%c0_71, %c0_72] : memref<256x512xf32, #tpu.memory_space<vmem>>, vector<256x64xf32>
      %c0_73 = arith.constant 0 : index
      %c0_74 = arith.constant 0 : index
      %134 = vector.load %arg7[%c0_73, %c0_74] : memref<4x128xf32, #tpu.memory_space<vmem>>, vector<1x64xf32>
      %cst_75 = arith.constant dense<0.000000e+00> : vector<1x64xf32>
      %135 = tpu.matmul %132, %133, %cst_75 {dimension_numbers = #tpu.dot_dimension_numbers<[1], [0], [0], [1], [0, 0, 1, 1], [], []>} : vector<1x256xf32>, vector<256x64xf32>, vector<1x64xf32> -> vector<1x64xf32>
      %136 = arith.addf %135, %134 : vector<1x64xf32>
      %cst_76 = arith.constant 0.000000e+00 : f32
      %137 = vector.broadcast %cst_76 : f32 to vector<1x64xf32>
      %138 = arith.cmpf ogt, %136, %137 : vector<1x64xf32>
      %cst_77 = arith.constant 0.000000e+00 : f32
      %139 = vector.broadcast %cst_77 : f32 to vector<1x64xf32>
      %140 = arith.minimumf %136, %139 : vector<1x64xf32>
      %141 = math.exp %140 : vector<1x64xf32>
      %cst_78 = arith.constant 1.000000e+00 : f32
      %142 = vector.broadcast %cst_78 : f32 to vector<1x64xf32>
      %143 = arith.subf %141, %142 : vector<1x64xf32>
      %cst_79 = arith.constant 1.67326319 : f32
      %144 = vector.broadcast %cst_79 : f32 to vector<1x64xf32>
      %145 = arith.mulf %144, %143 : vector<1x64xf32>
      %146 = arith.select %138, %136, %145 : vector<1x64xi1>, vector<1x64xf32>
      %cst_80 = arith.constant 1.05070102 : f32
      %147 = vector.broadcast %cst_80 : f32 to vector<1x64xf32>
      %148 = arith.mulf %147, %146 : vector<1x64xf32>
      %c0_81 = arith.constant 0 : index
      %c128_82 = arith.constant 128 : index
      %149 = vector.load %arg6[%c0_81, %c128_82] : memref<256x512xf32, #tpu.memory_space<vmem>>, vector<64x32xf32>
      %c1_83 = arith.constant 1 : index
      %c0_84 = arith.constant 0 : index
      %150 = vector.load %arg7[%c1_83, %c0_84] : memref<4x128xf32, #tpu.memory_space<vmem>>, vector<1x32xf32>
      %cst_85 = arith.constant dense<0.000000e+00> : vector<1x32xf32>
      %151 = tpu.matmul %148, %149, %cst_85 {dimension_numbers = #tpu.dot_dimension_numbers<[1], [0], [0], [1], [0, 0, 1, 1], [], []>} : vector<1x64xf32>, vector<64x32xf32>, vector<1x32xf32> -> vector<1x32xf32>
      %152 = arith.addf %151, %150 : vector<1x32xf32>
      %cst_86 = arith.constant 0.000000e+00 : f32
      %153 = vector.broadcast %cst_86 : f32 to vector<1x32xf32>
      %154 = arith.cmpf ogt, %152, %153 : vector<1x32xf32>
      %cst_87 = arith.constant 0.000000e+00 : f32
      %155 = vector.broadcast %cst_87 : f32 to vector<1x32xf32>
      %156 = arith.minimumf %152, %155 : vector<1x32xf32>
      %157 = math.exp %156 : vector<1x32xf32>
      %cst_88 = arith.constant 1.000000e+00 : f32
      %158 = vector.broadcast %cst_88 : f32 to vector<1x32xf32>
      %159 = arith.subf %157, %158 : vector<1x32xf32>
      %cst_89 = arith.constant 1.67326319 : f32
      %160 = vector.broadcast %cst_89 : f32 to vector<1x32xf32>
      %161 = arith.mulf %160, %159 : vector<1x32xf32>
      %162 = arith.select %154, %152, %161 : vector<1x32xi1>, vector<1x32xf32>
      %cst_90 = arith.constant 1.05070102 : f32
      %163 = vector.broadcast %cst_90 : f32 to vector<1x32xf32>
      %164 = arith.mulf %163, %162 : vector<1x32xf32>
      %c0_91 = arith.constant 0 : index
      %c256_92 = arith.constant 256 : index
      %165 = vector.load %arg6[%c0_91, %c256_92] : memref<256x512xf32, #tpu.memory_space<vmem>>, vector<32x16xf32>
      %c2_93 = arith.constant 2 : index
      %c0_94 = arith.constant 0 : index
      %166 = vector.load %arg7[%c2_93, %c0_94] : memref<4x128xf32, #tpu.memory_space<vmem>>, vector<1x16xf32>
      %cst_95 = arith.constant dense<0.000000e+00> : vector<1x16xf32>
      %167 = tpu.matmul %164, %165, %cst_95 {dimension_numbers = #tpu.dot_dimension_numbers<[1], [0], [0], [1], [0, 0, 1, 1], [], []>} : vector<1x32xf32>, vector<32x16xf32>, vector<1x16xf32> -> vector<1x16xf32>
      %168 = arith.addf %167, %166 : vector<1x16xf32>
      %cst_96 = arith.constant 0.000000e+00 : f32
      %169 = vector.broadcast %cst_96 : f32 to vector<1x16xf32>
      %170 = arith.cmpf ogt, %168, %169 : vector<1x16xf32>
      %cst_97 = arith.constant 0.000000e+00 : f32
      %171 = vector.broadcast %cst_97 : f32 to vector<1x16xf32>
      %172 = arith.minimumf %168, %171 : vector<1x16xf32>
      %173 = math.exp %172 : vector<1x16xf32>
      %cst_98 = arith.constant 1.000000e+00 : f32
      %174 = vector.broadcast %cst_98 : f32 to vector<1x16xf32>
      %175 = arith.subf %173, %174 : vector<1x16xf32>
      %cst_99 = arith.constant 1.67326319 : f32
      %176 = vector.broadcast %cst_99 : f32 to vector<1x16xf32>
      %177 = arith.mulf %176, %175 : vector<1x16xf32>
      %178 = arith.select %170, %168, %177 : vector<1x16xi1>, vector<1x16xf32>
      %cst_100 = arith.constant 1.05070102 : f32
      %179 = vector.broadcast %cst_100 : f32 to vector<1x16xf32>
      %180 = arith.mulf %179, %178 : vector<1x16xf32>
      %c0_101 = arith.constant 0 : index
      %c384_102 = arith.constant 384 : index
      %181 = vector.load %arg6[%c0_101, %c384_102] : memref<256x512xf32, #tpu.memory_space<vmem>>, vector<16x1xf32>
      %c3_103 = arith.constant 3 : index
      %c0_104 = arith.constant 0 : index
      %182 = vector.load %arg7[%c3_103, %c0_104] : memref<4x128xf32, #tpu.memory_space<vmem>>, vector<1x1xf32>
      %cst_105 = arith.constant dense<0.000000e+00> : vector<1x1xf32>
      %183 = tpu.matmul %180, %181, %cst_105 {dimension_numbers = #tpu.dot_dimension_numbers<[1], [0], [0], [1], [0, 0, 1, 1], [], []>} : vector<1x16xf32>, vector<16x1xf32>, vector<1x1xf32> -> vector<1x1xf32>
      %184 = arith.addf %183, %182 : vector<1x1xf32>
      %cst_106 = arith.constant 0.000000e+00 : f32
      %185 = vector.broadcast %cst_106 : f32 to vector<1x1xf32>
      %186 = arith.subf %185, %184 : vector<1x1xf32>
      %187 = math.exp %186 : vector<1x1xf32>
      %cst_107 = arith.constant 1.000000e+00 : f32
      %188 = vector.broadcast %cst_107 : f32 to vector<1x1xf32>
      %189 = arith.addf %188, %187 : vector<1x1xf32>
      %cst_108 = arith.constant 1.000000e+00 : f32
      %190 = vector.broadcast %cst_108 : f32 to vector<1x1xf32>
      %191 = arith.divf %190, %189 : vector<1x1xf32>
      %c0_109 = arith.constant 0 : index
      %c0_110 = arith.constant 0 : index
      %c0_111 = arith.constant 0 : index
      %192 = vector.load %arg8[%c0_109, %c0_110, %c0_111] : memref<1x1x1xf32, #tpu.memory_space<vmem>>, vector<1x1x1xf32>
      %193 = vector.shape_cast %192 : vector<1x1x1xf32> to vector<1x1xf32>
      %194 = vector.shape_cast %191 : vector<1x1xf32> to vector<1x1x1xf32>
      tpu.vector_store %arg8[%c0_109, %c0_110, %c0_111], %194 {strides = array<i32>} : memref<1x1x1xf32, #tpu.memory_space<vmem>>, vector<1x1x1xf32>,
    } else {
    }
    return
  }
  func.func @transform_0(%arg0: i32, %arg1: i32) -> (i32, i32, i32) {
    %c0_i32 = arith.constant 0 : i32
    %c0_i32_0 = arith.constant 0 : i32
    return %arg0, %c0_i32, %arg1 : i32, i32, i32
  }
  func.func @transform_1(%arg0: i32, %arg1: i32) -> (i32, i32) {
    %c0_i32 = arith.constant 0 : i32
    %c0_i32_0 = arith.constant 0 : i32
    return %arg1, %c0_i32 : i32, i32
  }
  func.func @transform_2(%arg0: i32, %arg1: i32) -> (i32, i32) {
    %c0_i32 = arith.constant 0 : i32
    %c0_i32_0 = arith.constant 0 : i32
    %c0_i32_1 = arith.constant 0 : i32
    return %c0_i32, %c0_i32_0 : i32, i32
  }
  func.func @transform_3(%arg0: i32, %arg1: i32) -> (i32, i32) {
    %c0_i32 = arith.constant 0 : i32
    %c0_i32_0 = arith.constant 0 : i32
    %c0_i32_1 = arith.constant 0 : i32
    return %c0_i32, %c0_i32_0 : i32, i32
  }
  func.func @transform_4(%arg0: i32, %arg1: i32) -> (i32, i32) {
    %c0_i32 = arith.constant 0 : i32
    %c0_i32_0 = arith.constant 0 : i32
    %c0_i32_1 = arith.constant 0 : i32
    return %c0_i32, %c0_i32_0 : i32, i32
  }
  func.func @transform_5(%arg0: i32, %arg1: i32) -> (i32, i32) {
    %c0_i32 = arith.constant 0 : i32
    %c0_i32_0 = arith.constant 0 : i32
    %c0_i32_1 = arith.constant 0 : i32
    return %c0_i32, %c0_i32_0 : i32, i32
  }
  func.func @transform_6(%arg0: i32, %arg1: i32) -> (i32, i32, i32) {
    %c0_i32 = arith.constant 0 : i32
    %c0_i32_0 = arith.constant 0 : i32
    %c0_i32_1 = arith.constant 0 : i32
    return %arg0, %c0_i32, %c0_i32_0 : i32, i32, i32
  }
}

</mosaic_0001>

<bundles_post_ra>
// kernel: tpu_custom_call.1
= control target key start
LH: loop header
LB: loop body
LE: loop exit
PB: predicated region body
PF: predicated region fallthrough
CT: control target
= control target key end

     0   :  { %s4645_s0 = inlined_call_operand.vmem [shape: f32[2,3,512], index: 0, kind: input, shape index: {}]   ;;  %s4646_s1 = inlined_call_operand.hbm [shape: f32[512,256], index: 1, kind: input, shape index: {}]   ;;  %s4647_s2 = inlined_call_operand.hbm [shape: f32[256,1152], index: 2, kind: input, shape index: {}]   ;;  %s4648_s3 = inlined_call_operand.vmem [shape: f32[256,8], index: 3, kind: input, shape index: {}]   ;;  %s4649_s4 = inlined_call_operand.hbm [shape: f32[256,512], index: 4, kind: input, shape index: {}]   ;;  %s4650_s5 = inlined_call_operand.hbm [shape: f32[4,128], index: 5, kind: input, shape index: {}]   ;;  %s4651_s6 = inlined_call_operand.vmem [shape: f32[2,1,1], index: 6, kind: output, shape index: {}]  }
   0x1   :  { %4666 = sst [smem:[#allocation20_spill]] %s4647_s2 }
   0x2   :  { %4667 = sst [smem:[#allocation21_spill]] %s4649_s4 }
   0x3   :  { %11 = vsyncpa [#allocation4], 0 }
   0x4   :  { %13 = vsyncpa [#allocation4 + $0x1], 0 }
   0x5   :  { %14 = vsyncpa [#allocation6], 0 }
   0x6   :  { %15 = vsyncpa [#allocation9], 0  ;;  %s3852_s21 = smov 0   ;;  %s3854_s22 = smov 0  }
   0x7   :  { %s3856_s23 = smov 0   ;;  %s3858_s24 = smov 0  }
   0x8   :  { %s3860_s25 = smov 0   ;;  %s3862_s26 = smov 0  }
   0x9   :  { %s3864_s27 = smov 0   ;;  %s3866_s28 = smov 0  }
   0xa LB: > { %s2818_s29 = sadd.s32 4294967295, %s3791_s28   ;;  %p81_p0 = scmp.ne.s32.totalorder %s3767_s22, %s3763_s21  ;;  %s3791_s28 = sphi %s3866_s28, %s21_s28   ;;  %s3787_s27 = sphi %s3864_s27, %s4696_s27   ;;  %s3783_s26 = sphi %s3862_s26, %s4695_s26   ;;  %s3779_s25 = sphi %s3860_s25, %s4694_s25   ;;  %s3775_s24 = sphi %s3858_s24, %s4693_s24   ;;  %s3771_s23 = sphi %s3856_s23, %s4692_s23   ;;  %s3767_s22 = sphi %s3854_s22, %s4691_s22   ;;  %s3763_s21 = sphi %s3852_s21, %s4690_s21  }
   0xb   : > { %p3892_p1 = scmp.eq.s32.totalorder %s2818_s29, 0  ;;  %p2820_p2 = scmp.ge.s32.totalorder %s3791_s28, 1 }
   0xc   : > { %p202_p3 = scmp.lt.s32.totalorder %s3791_s28, 9  ;;  %s3793_s9 = smov [#allocation5]  }
   0xd   : > { %s4668_s30 = scalar_select %p3892_p1, 1, 0 }
   0xe   : > { %p3900_p4 = por %p3892_p1, %p81_p0  ;;  %p3904_p5 = pnand %p2820_p2, %p202_p3 }
   0xf   : > { %s214_s10 = sshll.u32 %s3793_s9, 4  ;;  %s3794_s12 = smov [#allocation7]   ;;  %s215_s10 = int_to_ptr.vmem [resolvable:$true] %s214_s10 }
  0x10   : > { %p3366_p6 = pneg %p3904_p5  ;;  %s230_s13 = sshll.u32 %s3794_s12, 4  ;;  %s231_s13 = int_to_ptr.vmem [resolvable:$true] %s230_s13 }
  0x11   : > { %s3622_s14 = scalar_lea.vmem %s215_s10, 36864  ;;  %p3630_p12 = scmp.lt.s32.totalorder %s215_s10, %s215_s10 }
  0x12   : > { %p3912_p7 = pnand %p3366_p6, %p3892_p1  ;;  %p3623_p9 = scmp.ne.s32.totalorder %s215_s10, %s3622_s14 }
  0x13   : > { %p3631_p13 = scmp.lt.s32.totalorder %s3622_s14, %s3622_s14 }
  0x14   : > { %p3613_p8 = pneg %p3912_p7 }
  0x15   : > { %p3632_p0 = por %p3631_p13, %p3630_p12 }
  0x16   : > { %p3625_p10 = pnand %p3623_p9, %p3613_p8 }
  0x18   : > { %p3626_p11 = pneg %p3625_p10 }
  0x1a   : > { %p3633_p2 = pnand %p3632_p0, %p3626_p11 }
  0x1c   : > { %3636 = shalt.err (!%p3633_p2)
}
  0x1d   : > { %s3795_s15 = smov 1152   ;;  %s3796_s16 = smov 72  }
  0x1e   : > { %s4672_s2 = sld [smem:[#allocation20_spill]]  ;;  %s3648_s19 = scalar_lea.vmem %s231_s13, 16384 }
  0x1f   : > { %p3649_p3 = scmp.ne.s32.totalorder %s231_s13, %s3648_s19  ;;  %p3656_p10 = scmp.lt.s32.totalorder %s231_s13, %s231_s13 }
  0x20   : > { %p3657_p1 = scmp.lt.s32.totalorder %s3648_s19, %s3648_s19 }
  0x21   : > { %p3651_p6 = pnand %p3649_p3, %p3613_p8 }
  0x22   : > { %p3658_p12 = por %p3657_p1, %p3656_p10 }
  0x23   : > { %p3652_p9 = pneg %p3651_p6 }
  0x24   : > { %3369 = dma.hbm_to_vmem [thread:$0]  (!%p3912_p7), %s4672_s2, 36864, %s215_s10, [#allocation6], %s3795_s15, %s3795_s15, %s3796_s16  }
  0x25   : > { %p3659_p11 = pnand %p3658_p12, %p3652_p9 }
  0x27   : > { %3662 = shalt.err (!%p3659_p11)
}
  0x28   : > { %s3797_s20 = smov 512   ;;  %s3798_s21 = smov 32  }
  0x29   : > { %s4673_s4 = sld [smem:[#allocation21_spill]]  ;;  %s3799_s10 = smov [#allocation8]  }
  0x2a   : > { %s244_s12 = sshll.u32 %s3799_s10, 4  ;;  %s245_s12 = int_to_ptr.vmem [resolvable:$true] %s244_s12 }
  0x2b   : > { %s3674_s14 = scalar_lea.vmem %s245_s12, 64  ;;  %p3682_p2 = scmp.lt.s32.totalorder %s245_s12, %s245_s12 }
  0x2c   : > { %p3675_p13 = scmp.ne.s32.totalorder %s245_s12, %s3674_s14  ;;  %p3683_p3 = scmp.lt.s32.totalorder %s3674_s14, %s3674_s14 }
  0x2e   : > { %p3677_p0 = pnand %p3675_p13, %p3613_p8  ;;  %p3684_p6 = por %p3683_p3, %p3682_p2 }
  0x2f   : > { %3372 = dma.hbm_to_vmem [thread:$0]  (!%p3912_p7), %s4673_s4, 16384, %s231_s13, [#allocation6], %s3797_s20, %s3797_s20, %s3798_s21  }
  0x30   : > { %p3678_p1 = pneg %p3677_p0 }
  0x32   : > { %p3685_p9 = pnand %p3684_p6, %p3678_p1 }
  0x34   : > { %3688 = shalt.err (!%p3685_p9)
}
  0x35   : > { %3375 = dma.hbm_to_vmem [thread:$0]  (!%p3912_p7), %s4650_s5, 64, %s245_s12, [#allocation9]  }
  0x36   : > { %s30_s13 = sadd.s32 1, %s3783_s26  ;;  %s33_s17 = sadd.s32 1, %s3787_s27 }
  0x37   : > { %p31_p8 = scmp.ge.s32.totalorder %s30_s13, 4  ;;  %s68_s11 = sadd.s32 1, %s3771_s23 }
  0x38   : > { %p75_p10 = scmp.ne.s32.totalorder %s3771_s23, %s3767_s22  ;;  %p76_p12 = scmp.eq.s32.totalorder %s3791_s28, 0 }
  0x39   : > { %s4698_s13 = smov (%p31_p8, %s30_s13), 0  ;;  %s4700_s17 = smov (!%p31_p8, %s33_s17), %s3787_s27 }
  0x3a   : > { %s65_s18 = ssub.s32 %s3783_s26, %s4698_s13  ;;  %p35_p11 = scmp.ge.s32.totalorder %s4700_s17, 2 }
  0x3b   : > { %p66_p13 = scmp.eq.s32.totalorder %s65_s18, 0  ;;  %p77_p0 = por %p76_p12, %p75_p10 }
  0x3c   : > { %p3383_p1 = scmp.lt.s32.totalorder %s3791_s28, 8  ;;  %s4702_s17 = smov (%p35_p11, %s4700_s17), 0 }
  0x3d   : > { %s3957_s19 = scalar_select %p66_p13, %s3771_s23, %s68_s11  }
  0x3e   : > { %s266_s20 = sand.u32 1, %s3771_s23   ;;  %s2953_s21 = sshll.u32 %s3783_s26, 12 }
  0x3f   : > { %s2825_s29 = sshll.u32 %s266_s20, 8  ;;  %s277_s12 = scalar_lea.hbm %s4646_s1, %s2953_s21 }
  0x40   : > { %s270_s14 = scalar_lea.vmem [#allocation3], %s2825_s29  ;;  %p3964_p7 = pnand %p3383_p1, %p77_p0 }
  0x41   : > { %s278_s15 = sshll.u32 %s270_s14, 4  ;;  %s267_s18 = scalar_lea.sflag [#allocation4], %s266_s20  ;;  %s279_s15 = int_to_ptr.vmem [resolvable:$true] %s278_s15 }
  0x42   : > { %p3691_p2 = pneg %p3964_p7  ;;  %s3702_s11 = scalar_lea.vmem %s279_s15, 4096 }
  0x43   : > { %p3703_p3 = scmp.ne.s32.totalorder %s279_s15, %s3702_s11  ;;  %s3800_s2 = smov [#allocation3]  }
  0x44   : > { %s3707_s4 = sshll.u32 %s3800_s2, 4  ;;  %s3708_s4 = int_to_ptr.vmem [resolvable:$false] %s3707_s4 }
  0x45   : > { %p3705_p6 = pnand %p3703_p3, %p3691_p2  ;;  %s3709_s9 = scalar_lea.vmem %s3708_s4, 8192 }
  0x46   : > { %p3710_p8 = scmp.lt.s32.totalorder %s279_s15, %s3708_s4  ;;  %p3711_p10 = scmp.lt.s32.totalorder %s3709_s9, %s3702_s11 }
  0x47   : > { %p3706_p9 = pneg %p3705_p6 }
  0x48   : > { %p3712_p12 = por %p3711_p10, %p3710_p8 }
  0x4a   : > { %p3713_p11 = pnand %p3712_p12, %p3706_p9 }
  0x4c   : > { %3716 = shalt.err (!%p3713_p11)
}
  0x4d   : > { %s3801_s21 = smov 256   ;;  %s3802_s29 = smov 16  }
  0x4e   : > { %3379 = dma.hbm_to_vmem [thread:$0]  (!%p3964_p7), %s277_s12, 4096, %s279_s15, %s267_s18, %s3801_s21, %s3801_s21, %s3802_s29  }
  0x4f   : > { %290 = sbr.rel (%p3904_p5) target bundleno = 3169 (0xc61), region = 44 }
  0x54   : > { %s292_s20 = sand.u32 1, %s3767_s22  }
  0x55   : > { %s2830_s10 = sshll.u32 %s292_s20, 8  ;;  %s293_s2 = scalar_lea.sflag [#allocation4], %s292_s20 }
  0x56   : > { %s3975_s14 = scalar_lea.vmem [#allocation3], %s2830_s10 }
  0x57   : > { %3750 = dma.done.wait (%p3900_p4), %s293_s2, 4096  }
  0x58   : > { %3752 = vsyncadd (%p3900_p4), %s293_s2, 4294963200  ;;  %p4675_p13 = scmp.ne.s32.totalorder %s4668_s30, 0 }
  0x5a   : > { %3754 = dma.done.wait (%p4675_p13), [#allocation6], 53248  }
  0x5b   : > { %3756 = vsyncadd (%p4675_p13), [#allocation6], 4294914048 }
  0x5c   : > { %3758 = dma.done.wait (%p4675_p13), [#allocation9], 64  }
  0x5d   : > { %3760 = vsyncadd (%p4675_p13), [#allocation9], 4294967232  ;;  %p343_p5 = scmp.lt.s32.totalorder %s3779_s25, 1  ;;  %p345_p0 = scmp.lt.s32.totalorder %s3775_s24, 3 }
  0x5e   : > { %p2836_p4 = scmp.ne.s32.totalorder %s3775_s24, 0 }
  0x5f   : > { %s4704_s25 = smov (!%p343_p5, %s3779_s25), 1 }
  0x60   : > { %s346_s4 = scalar_select %p345_p0, %s3775_s24, 3 }
  0x61   : > { %s2834_s7 = sshll.u32 %s4704_s25, 2  ;;  %s354_s15 = scalar_lea.vmem %s4651_s6, %s4704_s25 }
  0x62   : > { %s348_s16 = sadd.s32 %s2834_s7, %s346_s4  ;;  %358 = sbr.rel (%p2836_p4) target bundleno = 107 (0x6b), region = 64 }
  0x63   : > { %s2835_s18 = sshll.u32 %s348_s16, 2 }
  0x64   : > { %s350_s9 = scalar_lea.vmem %s4645_s0, %s2835_s18 }
  0x67   : > { %v359_v0 = vlaneseq  ;;  %v3803_v1 = vmov 0.0  }
  0x69   : > { %vm361_vm0 = vcmp.lt.s32.totalorder %v359_v0, 256 }
  0x6a   : > { %363 = vst.msk [vmem:[#allocation2] sm:$0x3] %vm361_vm0, %v3803_v1 }
  0x6b PF: > { %v364_v2 = vld [vmem:[%s350_s9] sm:$0x7]  ;;  %vm386_vm1 = vcmask 1042432   ;;  %vm379_vm2 = vcmask 23552   ;;  %v366_v4 = vld [vmem:[#allocation5 + $0x48] sm:$0xff]  ;;  %v3804_v6 = vmov 0  }
  0x6c   : > { %v365_v3 = vld [vmem:[#allocation5] sm:$0xff]  ;;  %3144 = vmatprep.subr.msk.mxu0 %vm386_vm1, %v364_v2  ;;  %3474 = vset.pattern.permute.xlu0 %v3804_v6  ;;  %v481_v8 = vld [vmem:[#allocation5 + $0x8] sm:$0xff]  ;;  %vm509_vm3 = vcmask 130048   ;;  %v4020_v9 = vld [vmem:[%s4648_s3 + $0x18] sm:$0xff]  ;;  %v3805_v10 = vmov 1   ;;  %vm695_vm6 = vcmask 261120  }
  0x6d   : > { %3146 = vmatprep.mubr.msk.f32.mxu0 %vm379_vm2, %v365_v3  ;;  %v4007_v5 = vld [vmem:[%s4648_s3 + $0x8] sm:$0xff]  ;;  %3145 = vmatpush3.msk.msra.mxu0 %vm386_vm1, %v364_v2  ;;  %v4013_v7 = vld [vmem:[%s4648_s3] sm:$0xff]  ;;  %v4027_v11 = vld [vmem:[%s4648_s3 + $0x10] sm:$0xff]  ;;  %v3806_v38 = vmov 2   ;;  %vm1049_vm11 = vcmask 523264   ;;  %p2943_p1 = scmp.ne.s32.totalorder %s3775_s24, 3 }
  0x6e   : > { %3147 = vmatmul.mubr.msk.f32.vlgmr.msra.gmra.mxu0 %vm379_vm2, %v366_v4  ;;  %376 = vperm.xlu0 %3474, %v4007_v5   ;;  %v482_v32 = vld [vmem:[#allocation5 + $0x50] sm:$0xff]  ;;  %v483_v33 = vld [vmem:[#allocation5 + $0x98] sm:$0xff]  ;;  %v484_v34 = vld [vmem:[#allocation5 + $0xe0] sm:$0xff] }
  0x6f   : > { %3153 = vmatprep.mubr.msk.f32.mxu1 %vm509_vm3, %v481_v8  ;;  %3475 = vset.pattern.permute.xlu1 %v3805_v10  ;;  %v639_v35 = vld [vmem:[#allocation5 + $0x10] sm:$0xff]  ;;  %v4050_v39 = vld [vmem:[%s4648_s3 + $0x28] sm:$0xff]  ;;  %v4057_v40 = vld [vmem:[%s4648_s3 + $0x20] sm:$0xff] }
  0x70   : > { %506 = vperm.xlu1 %3475, %v4020_v9   ;;  %3167 = vmatprep.mubr.msk.f32.mxu0 %vm695_vm6, %v639_v35  ;;  %v4038_v36 = vld [vmem:[%s4648_s3 + $0x38] sm:$0xff]  ;;  %v4043_v37 = vld [vmem:[%s4648_s3 + $0x30] sm:$0xff] }
  0x71   : > { %v867_v35 = vld [vmem:[%s4648_s3 + $0x50] sm:$0xff] }
  0x72   : > { %371 = vperm.xlu0 %3474, %v4013_v7  }
  0x74   : > { %501 = vperm.xlu1 %3475, %v4027_v11  }
  0x76   : > { %3476 = vset.pattern.permute.xlu0 %v3805_v10 }
  0x77   : > { %496 = vperm.xlu0 %3476, %v4007_v5  }
  0x78   : > { %491 = vperm.xlu1 %3475, %v4013_v7  }
  0x7b   : > { %3478 = vset.pattern.permute.xlu0 %v3806_v38 }
  0x7c   : > { %3477 = vset.pattern.permute.xlu1 %v3806_v38  ;;  %687 = vperm.xlu0 %3478, %v4043_v37   ;;  %v866_v38 = vld [vmem:[%s4648_s3 + $0x48] sm:$0xff] }
  0x7d   : > { %692 = vperm.xlu1 %3477, %v4038_v36  }
  0x80   : > { %672 = vperm.xlu0 %3478, %v4020_v9  }
  0x81   : > { %682 = vperm.xlu1 %3477, %v4050_v39  }
  0x84   : > { %662 = vperm.xlu0 %3478, %v4007_v5  }
  0x85   : > { %677 = vperm.xlu1 %3477, %v4057_v40  }
  0x89   : > { %667 = vperm.xlu1 %3477, %v4027_v11  }
  0x8d   : > { %657 = vperm.xlu1 %3477, %v4013_v7  }
  0xe9   : > { %v377_v12 = vpop.permute.xlu0 %376 }
  0xeb   : > { %v507_v41 = vpop.permute.xlu1 %506 }
  0xed   : > { %v372_v15 = vpop.permute.xlu0 %371 }
  0xef   : > { %v502_v42 = vpop.permute.xlu1 %501 }
  0xf2   : > { %v497_v43 = vpop.permute.xlu0 %496 }
  0xf3   : > { %v492_v45 = vpop.permute.xlu1 %491 }
 0x12e   : > { %v3148_v13 = vpop.f32.mrf.mxu0 }
 0x12f   : > { %v462_v14 = vadd.f32 %v3148_v13, %v377_v12 }
 0x130   : > { %v456_v16 = vpop.f32.mrf.mxu0 }
 0x131   : > { %v468_v17 = vmin.f32 %v462_v14, 0.0  ;;  %v457_v18 = vadd.f32 %v456_v16, %v372_v15  ;;  %vm466_vm4 = vcmp.gt.f32.partialorder %v462_v14, 0.0 }
 0x133   : > { %v471_v19 = vmul.f32 1.442695, %v468_v17  ;;  %v467_v20 = vmin.f32 %v457_v18, 0.0  ;;  %vm465_vm5 = vcmp.gt.f32.partialorder %v457_v18, 0.0 }
 0x135   : > { %3489 = vpow2.f32 %v471_v19  ;;  %v469_v21 = vmul.f32 1.442695, %v467_v20 }
 0x137   : > { %3491 = vpow2.f32 %v469_v21  ;;  %v640_v21 = vld [vmem:[#allocation5 + $0x58] sm:$0xff] }
 0x142   : > { %v3490_v22 = vpop.eup %3489 }
 0x143   : > { %v2841_v23 = vadd.f32 -1.0, %v3490_v22  ;;  %v641_v22 = vld [vmem:[#allocation5 + $0xa0] sm:$0xff] }
 0x144   : > { %v3492_v24 = vpop.eup %3491 }
 0x145   : > { %v476_v25 = vmul.f32 1.6732632, %v2841_v23  ;;  %v2840_v26 = vadd.f32 -1.0, %v3492_v24  ;;  %v642_v23 = vld [vmem:[#allocation5 + $0xe8] sm:$0xff]  ;;  %v643_v24 = vld [vmem:[#allocation5 + $0x130] sm:$0xff] }
 0x147   : > { %v478_v27 = vsel %vm466_vm4, %v462_v14, %v476_v25  ;;  %v475_v28 = vmul.f32 1.6732632, %v2840_v26  ;;  %v644_v25 = vld [vmem:[#allocation5 + $0x178] sm:$0xff]  ;;  %v645_v26 = vld [vmem:[#allocation5 + $0x1c0] sm:$0xff] }
 0x148   : > { %v480_v29 = vmul.f32 1.050701, %v478_v27  ;;  %v646_v27 = vld [vmem:[#allocation5 + $0x208] sm:$0xff] }
 0x149   : > { %v477_v30 = vsel %vm465_vm5, %v457_v18, %v475_v28  ;;  %v825_v28 = vld [vmem:[#allocation5 + $0x18] sm:$0xff] }
 0x14a   : > { %3149 = vmatprep.subr.mxu1 %v480_v29  ;;  %v479_v31 = vmul.f32 1.050701, %v477_v30  ;;  %v3807_v30 = vmov 3  }
 0x14b   : > { %3150 = vmatpush3.msra.mxu1 %v480_v29  ;;  %v888_v29 = vld [vmem:[%s4648_s3 + $0xf8] sm:$0xff]  ;;  %3479 = vset.pattern.permute.xlu0 %v3807_v30 }
 0x14c   : > { %3151 = vmatprep.subr.mxu1 %v479_v31  ;;  %3480 = vset.pattern.permute.xlu1 %v3807_v30  ;;  %v834_v30 = vld [vmem:[#allocation5 + $0x2a0] sm:$0xff] }
 0x14d   : > { %3152 = vmatpush3.msra.mxu1 %v479_v31  ;;  %1046 = vperm.xlu0 %3479, %v888_v29   ;;  %v871_v31 = vld [vmem:[%s4648_s3 + $0x70] sm:$0xff]  ;;  %v833_v29 = vld [vmem:[#allocation5 + $0x258] sm:$0xff] }
 0x14e   : > { %3154 = vmatmul.mubr.msk.f32.vlgmr.msra.gmra.mxu1 %vm509_vm3, %v482_v32  ;;  %v870_v32 = vld [vmem:[%s4648_s3 + $0x68] sm:$0xff] }
 0x14f   : > { %3156 = vmatprep.mubr.msk.f32.mxu1 %vm509_vm3, %v483_v33  ;;  %v869_v33 = vld [vmem:[%s4648_s3 + $0x60] sm:$0xff] }
 0x151   : > { %961 = vperm.xlu0 %3479, %v871_v31   ;;  %v835_v31 = vld [vmem:[#allocation5 + $0x2e8] sm:$0xff] }
 0x152   : > { %3157 = vmatmul.mubr.msk.f32.gmra.mxu1 %vm509_vm3, %v484_v34  ;;  %v868_v34 = vld [vmem:[%s4648_s3 + $0x58] sm:$0xff] }
 0x153   : > { %3195 = vmatprep.mubr.msk.f32.mxu1 %vm1049_vm11, %v825_v28  ;;  %v832_v28 = vld [vmem:[#allocation5 + $0x210] sm:$0xff] }
 0x155   : > { %956 = vperm.xlu0 %3479, %v870_v32   ;;  %v836_v32 = vld [vmem:[#allocation5 + $0x330] sm:$0xff] }
 0x159   : > { %951 = vperm.xlu0 %3479, %v869_v33   ;;  %v837_v33 = vld [vmem:[#allocation5 + $0x378] sm:$0xff] }
 0x15d   : > { %946 = vperm.xlu0 %3479, %v868_v34   ;;  %v838_v34 = vld [vmem:[#allocation5 + $0x3c0] sm:$0xff] }
 0x161   : > { %941 = vperm.xlu0 %3479, %v867_v35   ;;  %v839_v35 = vld [vmem:[#allocation5 + $0x408] sm:$0xff] }
 0x165   : > { %936 = vperm.xlu0 %3479, %v866_v38   ;;  %v840_v38 = vld [vmem:[#allocation5 + $0x450] sm:$0xff] }
 0x20e   : > { %v3155_v44 = vpop.f32.mrf.mxu1 }
 0x20f   : > { %v594_v46 = vadd.f32 %v3155_v44, %v497_v43  ;;  %v887_v43 = vld [vmem:[%s4648_s3 + $0xf0] sm:$0xff]  ;;  %v886_v44 = vld [vmem:[%s4648_s3 + $0xe8] sm:$0xff] }
 0x210   : > { %v588_v47 = vpop.f32.mrf.mxu1 }
 0x211   : > { %v612_v48 = vmin.f32 %v594_v46, 0.0  ;;  %v589_v49 = vadd.f32 %v588_v47, %v492_v45  ;;  %vm608_vm8 = vcmp.gt.f32.partialorder %v594_v46, 0.0  ;;  %v885_v45 = vld [vmem:[%s4648_s3 + $0xe0] sm:$0xff]  ;;  %v883_v47 = vld [vmem:[%s4648_s3 + $0xd0] sm:$0xff] }
 0x212   : > { %v3158_v50 = vpop.f32.mrf.mxu1 }
 0x213   : > { %v617_v51 = vmul.f32 1.442695, %v612_v48  ;;  %v611_v52 = vmin.f32 %v589_v49, 0.0  ;;  %v604_v53 = vadd.f32 %v3158_v50, %v507_v41  ;;  %vm607_vm10 = vcmp.gt.f32.partialorder %v589_v49, 0.0  ;;  %v865_v41 = vld [vmem:[%s4648_s3 + $0x40] sm:$0xff]  ;;  %v882_v48 = vld [vmem:[%s4648_s3 + $0xc8] sm:$0xff] }
 0x214   : > { %v598_v54 = vpop.f32.mrf.mxu1  ;;  %931 = vperm.xlu0 %3479, %v865_v41   ;;  %v880_v50 = vld [vmem:[%s4648_s3 + $0xb8] sm:$0xff] }
 0x215   : > { %v615_v55 = vmul.f32 1.442695, %v611_v52  ;;  %v614_v56 = vmin.f32 %v604_v53, 0.0  ;;  %3493 = vpow2.f32 %v617_v51  ;;  %v599_v57 = vadd.f32 %v598_v54, %v502_v42  ;;  %v872_v42 = vld [vmem:[%s4648_s3 + $0x78] sm:$0xff]  ;;  %v879_v51 = vld [vmem:[%s4648_s3 + $0xb0] sm:$0xff]  ;;  %v878_v52 = vld [vmem:[%s4648_s3 + $0xa8] sm:$0xff] }
 0x216   : > { %vm610_vm7 = vcmp.gt.f32.partialorder %v604_v53, 0.0  ;;  %966 = vperm.xlu1 %3480, %v872_v42   ;;  %v876_v54 = vld [vmem:[%s4648_s3 + $0x98] sm:$0xff]  ;;  %v842_v42 = vld [vmem:[#allocation5 + $0x4e0] sm:$0xff] }
 0x217   : > { %v621_v58 = vmul.f32 1.442695, %v614_v56  ;;  %3495 = vpow2.f32 %v615_v55  ;;  %v613_v59 = vmin.f32 %v599_v57, 0.0  ;;  %vm609_vm9 = vcmp.gt.f32.partialorder %v599_v57, 0.0  ;;  %v875_v55 = vld [vmem:[%s4648_s3 + $0x90] sm:$0xff]  ;;  %v874_v56 = vld [vmem:[%s4648_s3 + $0x88] sm:$0xff] }
 0x218   : > { %926 = vperm.xlu0 %3479, %v4038_v36   ;;  %v841_v41 = vld [vmem:[#allocation5 + $0x498] sm:$0xff] }
 0x219   : > { %3497 = vpow2.f32 %v621_v58  ;;  %v619_v60 = vmul.f32 1.442695, %v613_v59  ;;  %v693_v58 = vpop.permute.xlu1 %692 }
 0x21a   : > { %1041 = vperm.xlu1 %3480, %v887_v43   ;;  %v843_v43 = vld [vmem:[#allocation5 + $0x528] sm:$0xff] }
 0x21b   : > { %3499 = vpow2.f32 %v619_v60 }
 0x21c   : > { %921 = vperm.xlu0 %3479, %v4043_v37  }
 0x21e   : > { %1036 = vperm.xlu1 %3480, %v886_v44   ;;  %v844_v44 = vld [vmem:[#allocation5 + $0x570] sm:$0xff] }
 0x220   : > { %916 = vperm.xlu0 %3479, %v4050_v39  }
 0x222   : > { %v3494_v61 = vpop.eup %3493  ;;  %1031 = vperm.xlu1 %3480, %v885_v45   ;;  %v845_v45 = vld [vmem:[#allocation5 + $0x5b8] sm:$0xff] }
 0x223   : > { %v2847_v0 = vadd.f32 -1.0, %v3494_v61 }
 0x224   : > { %v3496_v62 = vpop.eup %3495  ;;  %911 = vperm.xlu0 %3479, %v4057_v40  }
 0x225   : > { %v2846_v2 = vadd.f32 -1.0, %v3496_v62  ;;  %v628_v8 = vmul.f32 1.6732632, %v2847_v0  ;;  %v683_v62 = vpop.permute.xlu1 %682 }
 0x226   : > { %v3498_v63 = vpop.eup %3497 }
 0x227   : > { %v2849_v1 = vadd.f32 -1.0, %v3498_v63  ;;  %v627_v14 = vmul.f32 1.6732632, %v2846_v2  ;;  %v632_v16 = vsel %vm608_vm8, %v594_v46, %v628_v8  ;;  %v884_v46 = vld [vmem:[%s4648_s3 + $0xd8] sm:$0xff] }
 0x228   : > { %v3500_v3 = vpop.eup %3499  ;;  %v636_v19 = vmul.f32 1.050701, %v632_v16  ;;  %1026 = vperm.xlu1 %3480, %v884_v46   ;;  %906 = vperm.xlu0 %3479, %v4020_v9   ;;  %v846_v46 = vld [vmem:[#allocation5 + $0x600] sm:$0xff] }
 0x229   : > { %v630_v4 = vmul.f32 1.6732632, %v2849_v1  ;;  %v2848_v6 = vadd.f32 -1.0, %v3500_v3  ;;  %v631_v18 = vsel %vm607_vm10, %v589_v49, %v627_v14  ;;  %v881_v49 = vld [vmem:[%s4648_s3 + $0xc0] sm:$0xff]  ;;  %v688_v1 = vpop.permute.xlu0 %687  ;;  %v678_v3 = vpop.permute.xlu1 %677 }
 0x22a   : > { %v635_v20 = vmul.f32 1.050701, %v631_v18 }
 0x22b   : > { %v634_v10 = vsel %vm610_vm7, %v604_v53, %v630_v4  ;;  %v629_v13 = vmul.f32 1.6732632, %v2848_v6  ;;  %v877_v53 = vld [vmem:[%s4648_s3 + $0xa0] sm:$0xff] }
 0x22c   : > { %v638_v12 = vmul.f32 1.050701, %v634_v10  ;;  %1021 = vperm.xlu1 %3480, %v883_v47   ;;  %901 = vperm.xlu0 %3479, %v4027_v11   ;;  %v847_v47 = vld [vmem:[#allocation5 + $0x648] sm:$0xff] }
 0x22d   : > { %v633_v15 = vsel %vm609_vm9, %v599_v57, %v629_v13  ;;  %v873_v57 = vld [vmem:[%s4648_s3 + $0x80] sm:$0xff]  ;;  %v668_v14 = vpop.permute.xlu1 %667 }
 0x22e   : > { %3159 = vmatprep.subr.mxu0 %v638_v12  ;;  %v637_v17 = vmul.f32 1.050701, %v633_v15 }
 0x22f   : > { %3160 = vmatpush3.msra.mxu0 %v638_v12  ;;  %v673_v12 = vpop.permute.xlu0 %672 }
 0x230   : > { %3161 = vmatprep.subr.mxu0 %v637_v17  ;;  %1016 = vperm.xlu1 %3480, %v882_v48   ;;  %v848_v48 = vld [vmem:[#allocation5 + $0x690] sm:$0xff] }
 0x231   : > { %3162 = vmatpush3.msra.mxu0 %v637_v17  ;;  %896 = vperm.xlu0 %3479, %v4007_v5  }
 0x232   : > { %3163 = vmatprep.subr.mxu0 %v636_v19 }
 0x233   : > { %3164 = vmatpush3.msra.mxu0 %v636_v19  ;;  %v663_v17 = vpop.permute.xlu0 %662  ;;  %v658_v19 = vpop.permute.xlu1 %657 }
 0x234   : > { %3165 = vmatprep.subr.mxu0 %v635_v20  ;;  %1011 = vperm.xlu1 %3480, %v881_v49   ;;  %v849_v49 = vld [vmem:[#allocation5 + $0x6d8] sm:$0xff] }
 0x235   : > { %3166 = vmatpush3.msra.mxu0 %v635_v20  ;;  %891 = vperm.xlu0 %3479, %v4013_v7  }
 0x236   : > { %3168 = vmatmul.mubr.msk.f32.vlgmr.msra.gmra.mxu0 %vm695_vm6, %v640_v21 }
 0x237   : > { %3170 = vmatprep.mubr.msk.f32.mxu0 %vm695_vm6, %v641_v22  ;;  %v826_v22 = vld [vmem:[#allocation5 + $0x60] sm:$0xff] }
 0x238   : > { %1006 = vperm.xlu1 %3480, %v880_v50   ;;  %v850_v50 = vld [vmem:[#allocation5 + $0x720] sm:$0xff] }
 0x23a   : > { %3171 = vmatmul.mubr.msk.f32.gmra.mxu0 %vm695_vm6, %v642_v23  ;;  %v827_v23 = vld [vmem:[#allocation5 + $0xa8] sm:$0xff] }
 0x23b   : > { %3173 = vmatprep.mubr.msk.f32.mxu0 %vm695_vm6, %v643_v24  ;;  %v828_v24 = vld [vmem:[#allocation5 + $0xf0] sm:$0xff] }
 0x23c   : > { %1001 = vperm.xlu1 %3480, %v879_v51   ;;  %v851_v51 = vld [vmem:[#allocation5 + $0x768] sm:$0xff] }
 0x23e   : > { %3174 = vmatmul.mubr.msk.f32.gmra.mxu0 %vm695_vm6, %v644_v25  ;;  %v829_v25 = vld [vmem:[#allocation5 + $0x138] sm:$0xff] }
 0x23f   : > { %3176 = vmatprep.mubr.msk.f32.mxu0 %vm695_vm6, %v645_v26  ;;  %v830_v26 = vld [vmem:[#allocation5 + $0x180] sm:$0xff] }
 0x240   : > { %996 = vperm.xlu1 %3480, %v878_v52   ;;  %v852_v52 = vld [vmem:[#allocation5 + $0x7b0] sm:$0xff] }
 0x242   : > { %3177 = vmatmul.mubr.msk.f32.gmra.mxu0 %vm695_vm6, %v646_v27  ;;  %v831_v27 = vld [vmem:[#allocation5 + $0x1c8] sm:$0xff] }
 0x244   : > { %991 = vperm.xlu1 %3480, %v877_v53   ;;  %v853_v53 = vld [vmem:[#allocation5 + $0x7f8] sm:$0xff] }
 0x248   : > { %986 = vperm.xlu1 %3480, %v876_v54   ;;  %v854_v54 = vld [vmem:[#allocation5 + $0x840] sm:$0xff] }
 0x24c   : > { %981 = vperm.xlu1 %3480, %v875_v55   ;;  %v855_v55 = vld [vmem:[#allocation5 + $0x888] sm:$0xff] }
 0x250   : > { %976 = vperm.xlu1 %3480, %v874_v56   ;;  %v856_v56 = vld [vmem:[#allocation5 + $0x8d0] sm:$0xff] }
 0x254   : > { %971 = vperm.xlu1 %3480, %v873_v57   ;;  %v4182_v57 = vpop.permute.xlu0 %1046 }
 0x2f6   : > { %v3169_v59 = vpop.f32.mrf.mxu0 }
 0x2f7   : > { %v792_v20 = vadd.f32 %v3169_v59, %v663_v17 }
 0x2f8   : > { %v786_v60 = vpop.f32.mrf.mxu0 }
 0x2f9   : > { %v787_v21 = vadd.f32 %v786_v60, %v658_v19  ;;  %v3808_v19 = vmov 4  }
 0x2fa   : > { %v3172_v61 = vpop.f32.mrf.mxu0  ;;  %3481 = vset.pattern.permute.xlu1 %v3808_v19  ;;  %3482 = vset.pattern.permute.xlu0 %v3808_v19 }
 0x2fb   : > { %v802_v16 = vadd.f32 %v3172_v61, %v673_v12  ;;  %1672 = vperm.xlu1 %3481, %v4038_v36   ;;  %1668 = vperm.xlu0 %3482, %v4043_v37  }
 0x2fc   : > { %v796_v63 = vpop.f32.mrf.mxu0 }
 0x2fd   : > { %v797_v18 = vadd.f32 %v796_v63, %v668_v14 }
 0x2fe   : > { %v3175_v0 = vpop.f32.mrf.mxu0 }
 0x2ff   : > { %v812_v13 = vadd.f32 %v3175_v0, %v683_v62  ;;  %v4196_v0 = vpop.permute.xlu1 %966  ;;  %1664 = vperm.xlu1 %3481, %v4050_v39   ;;  %1656 = vperm.xlu0 %3482, %v4020_v9  }
 0x300   : > { %v806_v2 = vpop.f32.mrf.mxu0 }
 0x301   : > { %v807_v15 = vadd.f32 %v806_v2, %v678_v3 }
 0x302   : > { %v3178_v4 = vpop.f32.mrf.mxu0 }
 0x303   : > { %v822_v6 = vadd.f32 %v3178_v4, %v693_v58  ;;  %v4184_v58 = vpop.permute.xlu0 %961  ;;  %v4200_v2 = vpop.permute.xlu1 %1041  ;;  %v1628_v4 = vld [vmem:[#allocation5 + $0x28] sm:$0xff]  ;;  %1660 = vperm.xlu1 %3481, %v4057_v40   ;;  %1648 = vperm.xlu0 %3482, %v4007_v5  }
 0x304   : > { %v816_v8 = vpop.f32.mrf.mxu0  ;;  %1739 = vmatprep.mubr.f32.mxu0 %v1628_v4 }
 0x305   : > { %v817_v10 = vadd.f32 %v816_v8, %v688_v1  ;;  %3179 = vmatprep.subr.mxu1 %v822_v6 }
 0x306   : > { %3180 = vmatpush3.msra.mxu1 %v822_v6  ;;  %v1636_v6 = vld [vmem:[#allocation5 + $0x148] sm:$0xff] }
 0x307   : > { %3181 = vmatprep.subr.mxu1 %v817_v10  ;;  %v4186_v59 = vpop.permute.xlu0 %956  ;;  %v4202_v8 = vpop.permute.xlu1 %1036  ;;  %1652 = vperm.xlu1 %3481, %v4027_v11  }
 0x308   : > { %3182 = vmatpush3.msra.mxu1 %v817_v10 }
 0x309   : > { %3183 = vmatprep.subr.mxu1 %v812_v13 }
 0x30a   : > { %3184 = vmatpush3.msra.mxu1 %v812_v13 }
 0x30b   : > { %3185 = vmatprep.subr.mxu1 %v807_v15  ;;  %v4188_v60 = vpop.permute.xlu0 %951  ;;  %v4204_v12 = vpop.permute.xlu1 %1031  ;;  %1644 = vperm.xlu1 %3481, %v4013_v7  }
 0x30c   : > { %3186 = vmatpush3.msra.mxu1 %v807_v15 }
 0x30d   : > { %3187 = vmatprep.subr.mxu1 %v802_v16 }
 0x30e   : > { %3188 = vmatpush3.msra.mxu1 %v802_v16 }
 0x30f   : > { %3189 = vmatprep.subr.mxu1 %v797_v18  ;;  %v4190_v61 = vpop.permute.xlu0 %946  ;;  %v4206_v17 = vpop.permute.xlu1 %1026 }
 0x310   : > { %3190 = vmatpush3.msra.mxu1 %v797_v18 }
 0x311   : > { %3191 = vmatprep.subr.mxu1 %v792_v20 }
 0x312   : > { %3192 = vmatpush3.msra.mxu1 %v792_v20 }
 0x313   : > { %3193 = vmatprep.subr.mxu1 %v787_v21  ;;  %v4192_v62 = vpop.permute.xlu0 %941 }
 0x314   : > { %3194 = vmatpush3.msra.mxu1 %v787_v21 }
 0x315   : > { %3196 = vmatmul.mubr.msk.f32.vlgmr.msra.gmra.mxu1 %vm1049_vm11, %v826_v22 }
 0x316   : > { %3198 = vmatprep.mubr.msk.f32.mxu1 %vm1049_vm11, %v827_v23  ;;  %v4210_v23 = vpop.permute.xlu1 %1021 }
 0x317   : > { %v4194_v63 = vpop.permute.xlu0 %936 }
 0x319   : > { %3199 = vmatmul.mubr.msk.f32.gmra.mxu1 %vm1049_vm11, %v828_v24 }
 0x31a   : > { %3201 = vmatprep.mubr.msk.f32.mxu1 %vm1049_vm11, %v829_v25 }
 0x31b   : > { %v4198_v1 = vpop.permute.xlu0 %931 }
 0x31d   : > { %3202 = vmatmul.mubr.msk.f32.gmra.mxu1 %vm1049_vm11, %v830_v26 }
 0x31e   : > { %3204 = vmatprep.mubr.msk.f32.mxu1 %vm1049_vm11, %v831_v27 }
 0x31f   : > { %v927_v3 = vpop.permute.xlu0 %926 }
 0x321   : > { %3205 = vmatmul.mubr.msk.f32.gmra.mxu1 %vm1049_vm11, %v832_v28  ;;  %v4216_v28 = vpop.permute.xlu1 %1016 }
 0x322   : > { %3207 = vmatprep.mubr.msk.f32.mxu1 %vm1049_vm11, %v833_v29 }
 0x323   : > { %v922_v10 = vpop.permute.xlu0 %921 }
 0x325   : > { %3208 = vmatmul.mubr.msk.f32.gmra.mxu1 %vm1049_vm11, %v834_v30 }
 0x326   : > { %3210 = vmatprep.mubr.msk.f32.mxu1 %vm1049_vm11, %v835_v31  ;;  %v4219_v31 = vpop.permute.xlu1 %1011 }
 0x327   : > { %v917_v15 = vpop.permute.xlu0 %916 }
 0x329   : > { %3211 = vmatmul.mubr.msk.f32.gmra.mxu1 %vm1049_vm11, %v836_v32 }
 0x32a   : > { %3213 = vmatprep.mubr.msk.f32.mxu1 %vm1049_vm11, %v837_v33 }
 0x32b   : > { %v912_v21 = vpop.permute.xlu0 %911 }
 0x32d   : > { %3214 = vmatmul.mubr.msk.f32.gmra.mxu1 %vm1049_vm11, %v838_v34  ;;  %v4222_v34 = vpop.permute.xlu1 %1006 }
 0x32e   : > { %3216 = vmatprep.mubr.msk.f32.mxu1 %vm1049_vm11, %v839_v35 }
 0x32f   : > { %v907_v26 = vpop.permute.xlu0 %906 }
 0x331   : > { %3217 = vmatmul.mubr.msk.f32.gmra.mxu1 %vm1049_vm11, %v840_v38  ;;  %v4230_v11 = vpop.permute.xlu1 %1001 }
 0x332   : > { %3219 = vmatprep.mubr.msk.f32.mxu1 %vm1049_vm11, %v841_v41 }
 0x333   : > { %v902_v29 = vpop.permute.xlu0 %901 }
 0x335   : > { %3220 = vmatmul.mubr.msk.f32.gmra.mxu1 %vm1049_vm11, %v842_v42 }
 0x336   : > { %3222 = vmatprep.mubr.msk.f32.mxu1 %vm1049_vm11, %v843_v43 }
 0x337   : > { %v897_v32 = vpop.permute.xlu0 %896 }
 0x339   : > { %3223 = vmatmul.mubr.msk.f32.gmra.mxu1 %vm1049_vm11, %v844_v44 }
 0x33a   : > { %3225 = vmatprep.mubr.msk.f32.mxu1 %vm1049_vm11, %v845_v45 }
 0x33b   : > { %v892_v35 = vpop.permute.xlu0 %891 }
 0x33d   : > { %3226 = vmatmul.mubr.msk.f32.gmra.mxu1 %vm1049_vm11, %v846_v46 }
 0x33e   : > { %3228 = vmatprep.mubr.msk.f32.mxu1 %vm1049_vm11, %v847_v47 }
 0x341   : > { %3229 = vmatmul.mubr.msk.f32.gmra.mxu1 %vm1049_vm11, %v848_v48 }
 0x342   : > { %3231 = vmatprep.mubr.msk.f32.mxu1 %vm1049_vm11, %v849_v49 }
 0x345   : > { %3232 = vmatmul.mubr.msk.f32.gmra.mxu1 %vm1049_vm11, %v850_v50 }
 0x346   : > { %3234 = vmatprep.mubr.msk.f32.mxu1 %vm1049_vm11, %v851_v51 }
 0x349   : > { %3235 = vmatmul.mubr.msk.f32.gmra.mxu1 %vm1049_vm11, %v852_v52 }
 0x34a   : > { %3237 = vmatprep.mubr.msk.f32.mxu1 %vm1049_vm11, %v853_v53  ;;  %v4253_v53 = vpop.permute.xlu1 %996 }
 0x34d   : > { %3238 = vmatmul.mubr.msk.f32.gmra.mxu1 %vm1049_vm11, %v854_v54 }
 0x34e   : > { %3240 = vmatprep.mubr.msk.f32.mxu1 %vm1049_vm11, %v855_v55 }
 0x351   : > { %3241 = vmatmul.mubr.msk.f32.gmra.mxu1 %vm1049_vm11, %v856_v56 }
 0x352   : > { %1759 = vmatprep.mubr.f32.mxu1 %v1636_v6 }
 0x3d5   : > { %v3197_v13 = vpop.f32.mrf.mxu1 }
 0x3d6   : > { %v4228_v41 = vadd.f32 %v3197_v13, %v897_v32 }
 0x3d7   : > { %v1212_v14 = vpop.f32.mrf.mxu1 }
 0x3d8   : > { %4676 = vst [vmem:[#allocation13_spill] sm:$0xff] %v4228_v41  ;;  %v4232_v42 = vadd.f32 %v1212_v14, %v892_v35  ;;  %v1404_v46 = vmin.f32 %v4228_v41, 0.0 }
 0x3d9   : > { %v3200_v16 = vpop.f32.mrf.mxu1 }
 0x3da   : > { %4677 = vst [vmem:[#allocation14_spill] sm:$0xff] %v4232_v42  ;;  %v4236_v7 = vadd.f32 %v3200_v16, %v907_v26  ;;  %v1403_v48 = vmin.f32 %v4232_v42, 0.0  ;;  %v1437_v4 = vmul.f32 1.442695, %v1404_v46 }
 0x3db   : > { %v1222_v18 = vpop.f32.mrf.mxu1 }
 0x3dc   : > { %v4238_v44 = vadd.f32 %v1222_v18, %v902_v29  ;;  %v1406_v51 = vmin.f32 %v4236_v7, 0.0  ;;  %v1435_v14 = vmul.f32 1.442695, %v1403_v48  ;;  %3501 = vpow2.f32 %v1437_v4 }
 0x3dd   : > { %v3203_v20 = vpop.f32.mrf.mxu1 }
 0x3de   : > { %4678 = vst [vmem:[#allocation15_spill] sm:$0xff] %v4238_v44  ;;  %v4243_v47 = vadd.f32 %v3203_v20, %v917_v15  ;;  %v1405_v54 = vmin.f32 %v4238_v44, 0.0  ;;  %v1441_v18 = vmul.f32 1.442695, %v1406_v51  ;;  %3503 = vpow2.f32 %v1435_v14 }
 0x3df   : > { %v1232_v22 = vpop.f32.mrf.mxu1 }
 0x3e0   : > { %v4246_v49 = vadd.f32 %v1232_v22, %v912_v21  ;;  %v1408_v6 = vmin.f32 %v4243_v47, 0.0  ;;  %v1439_v19 = vmul.f32 1.442695, %v1405_v54  ;;  %3505 = vpow2.f32 %v1441_v18 }
 0x3e1   : > { %v3206_v24 = vpop.f32.mrf.mxu1 }
 0x3e2   : > { %v4251_v52 = vadd.f32 %v3206_v24, %v927_v3  ;;  %v1407_v15 = vmin.f32 %v4246_v49, 0.0  ;;  %3507 = vpow2.f32 %v1439_v19 }
 0x3e3   : > { %v1242_v25 = vpop.f32.mrf.mxu1 }
 0x3e4   : > { %v4256_v55 = vadd.f32 %v1242_v25, %v922_v10  ;;  %v1410_v10 = vmin.f32 %v4251_v52, 0.0  ;;  %v4278_v25 = vpop.permute.xlu1 %991  ;;  %v1443_v26 = vmul.f32 1.442695, %v1407_v15 }
 0x3e5   : > { %v3209_v27 = vpop.f32.mrf.mxu1 }
 0x3e6   : > { %v4262_v13 = vadd.f32 %v3209_v27, %v4194_v63  ;;  %v1409_v20 = vmin.f32 %v4256_v55, 0.0  ;;  %v1445_v63 = vmul.f32 1.442695, %v1408_v6  ;;  %v1449_v29 = vmul.f32 1.442695, %v1410_v10 }
 0x3e7   : > { %v1252_v36 = vpop.f32.mrf.mxu1 }
 0x3e8   : > { %v4266_v3 = vadd.f32 %v1252_v36, %v4198_v1  ;;  %v1412_v24 = vmin.f32 %v4262_v13, 0.0  ;;  %3509 = vpow2.f32 %v1445_v63  ;;  %v4299_v51 = vpop.permute.xlu1 %986  ;;  %vm1380_vm7 = vcmp.gt.f32.partialorder %v4262_v13, 0.0 }
 0x3e9   : > { %v3212_v37 = vpop.f32.mrf.mxu1  ;;  %3511 = vpow2.f32 %v1443_v26 }
 0x3ea   : > { %v4281_v1 = vadd.f32 %v3212_v37, %v4190_v61  ;;  %v1411_v27 = vmin.f32 %v4266_v3, 0.0  ;;  %v1453_v46 = vmul.f32 1.442695, %v1412_v24  ;;  %3513 = vpow2.f32 %v1449_v29 }
 0x3eb   : > { %v1262_v30 = vpop.f32.mrf.mxu1  ;;  %vm1379_vm9 = vcmp.gt.f32.partialorder %v4266_v3, 0.0 }
 0x3ec   : > { %v4285_v36 = vadd.f32 %v1262_v30, %v4192_v62  ;;  %v1414_v48 = vmin.f32 %v4281_v1, 0.0  ;;  %v1451_v30 = vmul.f32 1.442695, %v1411_v27  ;;  %v4313_v24 = vpop.permute.xlu1 %981  ;;  %v3502_v27 = vpop.eup %3501  ;;  %vm1382_vm0 = vcmp.gt.f32.partialorder %v4281_v1, 0.0 }
 0x3ed   : > { %v3215_v39 = vpop.f32.mrf.mxu1 }
 0x3ee   : > { %v4288_v32 = vadd.f32 %v3215_v39, %v4186_v59  ;;  %v1413_v59 = vmin.f32 %v4285_v36, 0.0  ;;  %v1457_v6 = vmul.f32 1.442695, %v1414_v48  ;;  %vm1381_vm2 = vcmp.gt.f32.partialorder %v4285_v36, 0.0 }
 0x3ef   : > { %v1272_v9 = vpop.f32.mrf.mxu1 }
 0x3f0   : > { %v4291_v35 = vadd.f32 %v1272_v9, %v4188_v60  ;;  %v1416_v60 = vmin.f32 %v4288_v32, 0.0  ;;  %vm1384_vm14 = vcmp.gt.f32.partialorder %v4288_v32, 0.0 }
 0x3f1   : > { %v3218_v33 = vpop.f32.mrf.mxu1 }
 0x3f2   : > { %v4273_v21 = vadd.f32 %v3218_v33, %v4196_v0  ;;  %v1447_v33 = vmul.f32 1.442695, %v1409_v20  ;;  %v1415_v9 = vmin.f32 %v4291_v35, 0.0  ;;  %v1461_v15 = vmul.f32 1.442695, %v1416_v60 }
 0x3f3   : > { %v1282_v40 = vpop.f32.mrf.mxu1  ;;  %vm1383_vm15 = vcmp.gt.f32.partialorder %v4291_v35, 0.0 }
 0x3f4   : > { %v1418_v61 = vmin.f32 %v4273_v21, 0.0  ;;  %v4296_v62 = vadd.f32 %v1282_v40, %v4184_v58  ;;  %3515 = vpow2.f32 %v1447_v33  ;;  %v1455_v40 = vmul.f32 1.442695, %v1413_v59 }
 0x3f5   : > { %v4224_v5 = vpop.f32.mrf.mxu1  ;;  %3517 = vpow2.f32 %v1453_v46  ;;  %v1459_v20 = vmul.f32 1.442695, %v1415_v9  ;;  %vm1386_vm12 = vcmp.gt.f32.partialorder %v4273_v21, 0.0 }
 0x3f6   : > { %v1465_v54 = vmul.f32 1.442695, %v1418_v61  ;;  %v1417_v58 = vmin.f32 %v4296_v62, 0.0  ;;  %3519 = vpow2.f32 %v1451_v30  ;;  %vm1385_vm13 = vcmp.gt.f32.partialorder %v4296_v62, 0.0 }
 0x3f7   : > { %v4226_v38 = vpop.f32.mrf.mxu1 }
 0x3f8   : > { %3521 = vpow2.f32 %v1465_v54  ;;  %v1463_v26 = vmul.f32 1.442695, %v1417_v58 }
 0x3f9   : > { %v4234_v43 = vpop.f32.mrf.mxu1  ;;  %3523 = vpow2.f32 %v1457_v6  ;;  %v977_v6 = vpop.permute.xlu1 %976 }
 0x3fa   : > { %3525 = vpow2.f32 %v1455_v40 }
 0x3fb   : > { %v4240_v45 = vpop.f32.mrf.mxu1  ;;  %3527 = vpow2.f32 %v1461_v15 }
 0x3fc   : > { %3529 = vpow2.f32 %v1459_v20 }
 0x3fd   : > { %v4248_v50 = vpop.f32.mrf.mxu1  ;;  %3531 = vpow2.f32 %v1463_v26 }
 0x3ff   : > { %v4258_v56 = vpop.f32.mrf.mxu1 }
 0x401   : > { %v4268_v16 = vpop.f32.mrf.mxu1 }
 0x403   : > { %v4275_v22 = vpop.f32.mrf.mxu1 }
 0x404   : > { %v4342_v58 = vadd.f32 %v4275_v22, %v4230_v11 }
 0x405   : > { %v3233_v0 = vpop.f32.mrf.mxu1 }
 0x406   : > { %v4316_v29 = vadd.f32 %v3233_v0, %v4216_v28 }
 0x407   : > { %v1332_v37 = vpop.f32.mrf.mxu1 }
 0x408   : > { %v4325_v30 = vadd.f32 %v1332_v37, %v4219_v31 }
 0x409   : > { %v3236_v39 = vpop.f32.mrf.mxu1 }
 0x40a   : > { %v4305_v18 = vadd.f32 %v3236_v39, %v4206_v17 }
 0x40b   : > { %v1342_v4 = vpop.f32.mrf.mxu1 }
 0x40c   : > { %v4308_v10 = vadd.f32 %v1342_v4, %v4210_v23  ;;  %v1430_v17 = vmin.f32 %v4305_v18, 0.0  ;;  %v3504_v23 = vpop.eup %3503  ;;  %v1428_v4 = vmin.f32 %v4316_v29, 0.0  ;;  %vm1398_vm10 = vcmp.gt.f32.partialorder %v4305_v18, 0.0 }
 0x40d   : > { %v3239_v14 = vpop.f32.mrf.mxu1  ;;  %v3506_v48 = vpop.eup %3505 }
 0x40e   : > { %v4311_v19 = vadd.f32 %v3239_v14, %v4202_v8  ;;  %v1429_v8 = vmin.f32 %v4308_v10, 0.0  ;;  %v1489_v59 = vmul.f32 1.442695, %v1430_v17  ;;  %v3508_v39 = vpop.eup %3507  ;;  %v1485_v22 = vmul.f32 1.442695, %v1428_v4 }
 0x40f   : > { %v1352_v63 = vpop.f32.mrf.mxu1  ;;  %v3510_v54 = vpop.eup %3509 }
 0x410   : > { %v1432_v61 = vmin.f32 %v4311_v19, 0.0  ;;  %v4322_v46 = vadd.f32 %v1352_v63, %v4204_v12  ;;  %v4333_v12 = vadd.f32 %v4268_v16, %v4222_v34  ;;  %3533 = vpow2.f32 %v1489_v59 }
 0x411   : > { %v3242_v33 = vpop.f32.mrf.mxu1  ;;  %v1487_v40 = vmul.f32 1.442695, %v1429_v8  ;;  %v1427_v34 = vmin.f32 %v4325_v30, 0.0  ;;  %v4352_v8 = vadd.f32 %v4224_v5, %v977_v6  ;;  %v1425_v59 = vmin.f32 %v4342_v58, 0.0 }
 0x412   : > { %v4328_v28 = vadd.f32 %v3242_v33, %v4182_v57  ;;  %v1493_v60 = vmul.f32 1.442695, %v1432_v61  ;;  %v1431_v9 = vmin.f32 %v4322_v46, 0.0  ;;  %v3512_v57 = vpop.eup %3511  ;;  %v1426_v11 = vmin.f32 %v4333_v12, 0.0 }
 0x413   : > { %v1362_v0 = vpop.f32.mrf.mxu1  ;;  %v3514_v15 = vpop.eup %3513  ;;  %4679 = vst [vmem:[#allocation16_spill] sm:$0xff] %v4352_v8  ;;  %v4356_v61 = vadd.f32 %v4258_v56, %v4278_v25  ;;  %v4369_v6 = vadd.f32 -1.0, %v3504_v23  ;;  %v4383_v23 = vadd.f32 -1.0, %v3512_v57  ;;  %vm1400_vm4 = vcmp.gt.f32.partialorder %v4311_v19, 0.0 }
 0x414   : > { %v1434_v31 = vmin.f32 %v4328_v28, 0.0  ;;  %v4338_v37 = vadd.f32 %v1362_v0, %v4200_v2  ;;  %v1491_v14 = vmul.f32 1.442695, %v1431_v9  ;;  %3535 = vpow2.f32 %v1493_v60  ;;  %v3516_v63 = vpop.eup %3515  ;;  %v972_v60 = vpop.permute.xlu1 %971 }
 0x415   : > { %v4348_v2 = vadd.f32 %v4248_v50, %v4253_v53  ;;  %v3518_v26 = vpop.eup %3517  ;;  %v1483_v50 = vmul.f32 1.442695, %v1427_v34  ;;  %v4359_v0 = vadd.f32 -1.0, %v3502_v27  ;;  %v4363_v9 = vadd.f32 %v4234_v43, %v4299_v51  ;;  %4681 = vst [vmem:[#allocation18_spill] sm:$0xff] %v4369_v6 }
 0x416   : > { %v1497_v16 = vmul.f32 1.442695, %v1434_v31  ;;  %v1433_v20 = vmin.f32 %v4338_v37, 0.0  ;;  %3537 = vpow2.f32 %v1491_v14  ;;  %v3520_v33 = vpop.eup %3519  ;;  %v4366_v5 = vadd.f32 %v4226_v38, %v972_v60 }
 0x417   : > { %v3522_v53 = vpop.eup %3521  ;;  %v1424_v31 = vmin.f32 %v4348_v2, 0.0  ;;  %v1481_v56 = vmul.f32 1.442695, %v1426_v11  ;;  %v1420_v27 = vmin.f32 %v4352_v8, 0.0  ;;  %v4376_v14 = vadd.f32 %v4240_v45, %v4313_v24 }
 0x418   : > { %3539 = vpow2.f32 %v1497_v16  ;;  %v1495_v17 = vmul.f32 1.442695, %v1433_v20  ;;  %v3524_v4 = vpop.eup %3523  ;;  %4680 = vst [vmem:[#allocation17_spill] sm:$0xff] %v4366_v5  ;;  %v2905_v51 = vadd.f32 -1.0, %v3522_v53  ;;  %v1423_v38 = vmin.f32 %v4356_v61, 0.0 }
 0x419   : > { %3541 = vpow2.f32 %v1487_v40  ;;  %v3526_v25 = vpop.eup %3525  ;;  %v4371_v40 = vadd.f32 -1.0, %v3506_v48  ;;  %4682 = vst [vmem:[#allocation19_spill] sm:$0xff] %v4376_v14  ;;  %v1479_v34 = vmul.f32 1.442695, %v1425_v59  ;;  %v4379_v20 = vadd.f32 -1.0, %v3508_v39 }
 0x41a   : > { %3543 = vpow2.f32 %v1495_v17  ;;  %v3528_v43 = vpop.eup %3527  ;;  %v4381_v11 = vadd.f32 -1.0, %v3510_v54  ;;  %v1422_v48 = vmin.f32 %v4363_v9, 0.0  ;;  %v4386_v17 = vadd.f32 -1.0, %v3514_v15 }
 0x41b   : > { %3545 = vpow2.f32 %v1485_v22  ;;  %v3530_v16 = vpop.eup %3529  ;;  %v1419_v45 = vmin.f32 %v4366_v5, 0.0  ;;  %v1477_v24 = vmul.f32 1.442695, %v1424_v31  ;;  %v2901_v53 = vadd.f32 -1.0, %v3524_v4 }
 0x41c   : > { %3547 = vpow2.f32 %v1483_v50  ;;  %v3532_v22 = vpop.eup %3531  ;;  %v1469_v59 = vmul.f32 1.442695, %v1420_v27  ;;  %v1421_v39 = vmin.f32 %v4376_v14, 0.0  ;;  %v4391_v54 = vadd.f32 -1.0, %v3516_v63 }
 0x41d   : > { %3549 = vpow2.f32 %v1481_v56  ;;  %v3534_v50 = vpop.eup %3533  ;;  %v1546_v57 = vmul.f32 1.6732632, %v2905_v51  ;;  %v1475_v60 = vmul.f32 1.442695, %v1423_v38  ;;  %v4394_v42 = vadd.f32 -1.0, %v3518_v26 }
 0x41e   : > { %3551 = vpow2.f32 %v1479_v34  ;;  %v2903_v5 = vadd.f32 -1.0, %v3528_v43  ;;  %v2904_v31 = vadd.f32 -1.0, %v3532_v22  ;;  %v1473_v56 = vmul.f32 1.442695, %v1422_v48 }
 0x41f   : > { %v4396_v41 = vadd.f32 -1.0, %v3520_v33  ;;  %v1467_v27 = vmul.f32 1.442695, %v1419_v45  ;;  %3553 = vpow2.f32 %v1477_v24  ;;  %v4399_v51 = vmul.f32 1.6732632, %v2901_v53 }
 0x420   : > { %v2902_v6 = vadd.f32 -1.0, %v3530_v16  ;;  %3555 = vpow2.f32 %v1469_v59  ;;  %v1471_v38 = vmul.f32 1.442695, %v1421_v39  ;;  %v1578_v26 = vsel %vm1386_vm12, %v4273_v21, %v1546_v57 }
 0x421   : > { %v3536_v15 = vpop.eup %3535  ;;  %3557 = vpow2.f32 %v1475_v60  ;;  %v2900_v22 = vadd.f32 -1.0, %v3526_v25  ;;  %v1544_v45 = vmul.f32 1.6732632, %v2903_v5  ;;  %v1545_v24 = vmul.f32 1.6732632, %v2904_v31 }
 0x422   : > { %v2919_v63 = vadd.f32 -1.0, %v3536_v15  ;;  %3559 = vpow2.f32 %v1473_v56  ;;  %v2917_v39 = vadd.f32 -1.0, %v3534_v50  ;;  %v1543_v44 = vmul.f32 1.6732632, %v2902_v6 }
 0x423   : > { %v3538_v4 = vpop.eup %3537  ;;  %v1610_v14 = vmul.f32 1.050701, %v1578_v26  ;;  %3561 = vpow2.f32 %v1471_v38  ;;  %vm1402_vm1 = vcmp.gt.f32.partialorder %v4328_v28, 0.0  ;;  %v1577_v60 = vsel %vm1385_vm13, %v4296_v62, %v1545_v24 }
 0x424   : > { %v2918_v43 = vadd.f32 -1.0, %v3538_v4  ;;  %v1560_v59 = vmul.f32 1.6732632, %v2919_v63  ;;  %vm1401_vm5 = vcmp.gt.f32.partialorder %v4338_v37, 0.0  ;;  %v1576_v63 = vsel %vm1384_vm14, %v4288_v32, %v1544_v45 }
 0x425   : > { %v3540_v8 = vpop.eup %3539  ;;  %3563 = vpow2.f32 %v1467_v27  ;;  %vm1399_vm8 = vcmp.gt.f32.partialorder %v4322_v46, 0.0  ;;  %v1609_v38 = vmul.f32 1.050701, %v1577_v60  ;;  %v1575_v32 = vsel %vm1383_vm15, %v4291_v35, %v1543_v44 }
 0x426   : > { %v3542_v34 = vpop.eup %3541  ;;  %v2921_v33 = vadd.f32 -1.0, %v3540_v8  ;;  %v1559_v5 = vmul.f32 1.6732632, %v2918_v43  ;;  %v1592_v31 = vsel %vm1400_vm4, %v4311_v19, %v1560_v59  ;;  %vm1378_vm12 = vcmp.gt.f32.partialorder %v4251_v52, 0.0 }
 0x427   : > { %v3544_v48 = vpop.eup %3543  ;;  %v2916_v25 = vadd.f32 -1.0, %v3542_v34  ;;  %v1624_v27 = vmul.f32 1.050701, %v1592_v31  ;;  %v1608_v43 = vmul.f32 1.050701, %v1576_v63  ;;  %v1574_v44 = vsel %vm1382_vm0, %v4281_v1, %v4399_v51 }
 0x428   : > { %v1562_v16 = vmul.f32 1.6732632, %v2921_v33  ;;  %v2920_v53 = vadd.f32 -1.0, %v3544_v48  ;;  %v3546_v15 = vpop.eup %3545  ;;  %v1591_v19 = vsel %vm1399_vm8, %v4322_v46, %v1559_v5  ;;  %v1541_v33 = vmul.f32 1.6732632, %v2900_v22 }
 0x429   : > { %v3548_v57 = vpop.eup %3547  ;;  %v2915_v56 = vadd.f32 -1.0, %v3546_v15  ;;  %v1540_v22 = vmul.f32 1.6732632, %v4394_v42  ;;  %vm1397_vm13 = vcmp.gt.f32.partialorder %v4308_v10, 0.0  ;;  %v1623_v35 = vmul.f32 1.050701, %v1591_v19 }
 0x42a   : > { %v1594_v21 = vsel %vm1402_vm1, %v4328_v28, %v1562_v16  ;;  %v1561_v8 = vmul.f32 1.6732632, %v2920_v53  ;;  %v1558_v28 = vmul.f32 1.6732632, %v2917_v39  ;;  %v3550_v4 = vpop.eup %3549  ;;  %v2914_v34 = vadd.f32 -1.0, %v3548_v57 }
 0x42b   : > { %v1626_v6 = vmul.f32 1.050701, %v1594_v21  ;;  %v3552_v26 = vpop.eup %3551  ;;  %v2913_v48 = vadd.f32 -1.0, %v3550_v4  ;;  %vm1377_vm14 = vcmp.gt.f32.partialorder %v4256_v55, 0.0  ;;  %v1539_v39 = vmul.f32 1.6732632, %v4396_v41 }
 0x42c   : > { %v1593_v50 = vsel %vm1401_vm5, %v4338_v37, %v1561_v8  ;;  %v1557_v37 = vmul.f32 1.6732632, %v2916_v25  ;;  %v1590_v46 = vsel %vm1398_vm10, %v4305_v18, %v1558_v28  ;;  %v3554_v45 = vpop.eup %3553  ;;  %v1607_v18 = vmul.f32 1.050701, %v1575_v32 }
 0x42d   : > { %3015 = vmatprep.subr.mxu0 %v1626_v6  ;;  %3320 = vmatprep.subr.mxu1 %v1626_v6  ;;  %v1625_v62 = vmul.f32 1.050701, %v1593_v50  ;;  %v4435_v24 = vpop.eup %3555  ;;  %v1555_v42 = vmul.f32 1.6732632, %v2914_v34  ;;  %v2912_v53 = vadd.f32 -1.0, %v3552_v26  ;;  %v1573_v1 = vsel %vm1381_vm2, %v4285_v36, %v1541_v33 }
 0x42e   : > { %3016 = vmatpush3.msra.mxu0 %v1610_v14  ;;  %3336 = vmatpush3.msra.mxu1 %v1610_v14  ;;  %v1556_v14 = vmul.f32 1.6732632, %v2915_v56  ;;  %v1589_v16 = vsel %vm1397_vm13, %v4308_v10, %v1557_v37  ;;  %v3558_v59 = vpop.eup %3557  ;;  %vm1396_vm15 = vcmp.gt.f32.partialorder %v4316_v29, 0.0  ;;  %v1622_v51 = vmul.f32 1.050701, %v1590_v46 }
 0x42f   : > { %3017 = vmatprep.subr.mxu0 %v1625_v62  ;;  %3321 = vmatprep.subr.mxu1 %v1625_v62  ;;  %v3560_v15 = vpop.eup %3559  ;;  %vm1376_vm0 = vcmp.gt.f32.partialorder %v4243_v47, 0.0  ;;  %v1606_v21 = vmul.f32 1.050701, %v1574_v44  ;;  %v1554_v8 = vmul.f32 1.6732632, %v2913_v48  ;;  %v2911_v5 = vadd.f32 -1.0, %v3554_v45 }
 0x430   : > { %3018 = vmatpush3.msra.mxu0 %v1609_v38  ;;  %3337 = vmatpush3.msra.mxu1 %v1609_v38  ;;  %v1588_v10 = vsel %vm1396_vm15, %v4316_v29, %v1556_v14  ;;  %v1538_v41 = vmul.f32 1.6732632, %v4386_v17  ;;  %v1572_v36 = vsel %vm1380_vm7, %v4262_v13, %v1540_v22  ;;  %vm1395_vm1 = vcmp.gt.f32.partialorder %v4325_v30, 0.0  ;;  %v3562_v57 = vpop.eup %3561 }
 0x431   : > { %3019 = vmatprep.subr.mxu0 %v1624_v27  ;;  %3322 = vmatprep.subr.mxu1 %v1624_v27  ;;  %v1621_v25 = vmul.f32 1.050701, %v1589_v16  ;;  %vm1375_vm2 = vcmp.gt.f32.partialorder %v4246_v49, 0.0  ;;  %v1605_v60 = vmul.f32 1.050701, %v1573_v1  ;;  %v1587_v29 = vsel %vm1395_vm1, %v4325_v30, %v1555_v42 }
 0x432   : > { %3020 = vmatpush3.msra.mxu0 %v1608_v43  ;;  %3338 = vmatpush3.msra.mxu1 %v1608_v43  ;;  %v1553_v6 = vmul.f32 1.6732632, %v2912_v53  ;;  %v2910_v50 = vadd.f32 -1.0, %v3558_v59  ;;  %v1537_v17 = vmul.f32 1.6732632, %v4391_v54  ;;  %v1571_v13 = vsel %vm1379_vm9, %v4266_v3, %v1539_v39  ;;  %v3564_v62 = vpop.eup %3563  ;;  %v4685_v53 = vld [vmem:[#allocation18_spill] sm:$0xff] }
 0x433   : > { %3021 = vmatprep.subr.mxu0 %v1623_v35  ;;  %3323 = vmatprep.subr.mxu1 %v1623_v35  ;;  %vm1394_vm4 = vcmp.gt.f32.partialorder %v4333_v12, 0.0  ;;  %v1620_v31 = vmul.f32 1.050701, %v1588_v10  ;;  %v1604_v28 = vmul.f32 1.050701, %v1572_v36  ;;  %v2909_v30 = vadd.f32 -1.0, %v3560_v15 }
 0x434   : > { %3022 = vmatpush3.msra.mxu0 %v1607_v18  ;;  %3339 = vmatpush3.msra.mxu1 %v1607_v18  ;;  %v1586_v56 = vsel %vm1394_vm4, %v4333_v12, %v1554_v8  ;;  %v1552_v4 = vmul.f32 1.6732632, %v2911_v5  ;;  %v1536_v63 = vmul.f32 1.6732632, %v4381_v11  ;;  %v1570_v54 = vsel %vm1378_vm12, %v4251_v52, %v1538_v41  ;;  %v4683_v35 = vld [vmem:[#allocation19_spill] sm:$0xff]  ;;  %v4687_v39 = vld [vmem:[#allocation13_spill] sm:$0xff] }
 0x435   : > { %3023 = vmatprep.subr.mxu0 %v1622_v51  ;;  %3324 = vmatprep.subr.mxu1 %v1622_v51  ;;  %vm1393_vm5 = vcmp.gt.f32.partialorder %v4342_v58, 0.0  ;;  %v1619_v3 = vmul.f32 1.050701, %v1587_v29  ;;  %v1603_v38 = vmul.f32 1.050701, %v1571_v13  ;;  %v2908_v37 = vadd.f32 -1.0, %v3562_v57 }
 0x436   : > { %3024 = vmatpush3.msra.mxu0 %v1606_v21  ;;  %3340 = vmatpush3.msra.mxu1 %v1606_v21  ;;  %v1585_v19 = vsel %vm1393_vm5, %v4342_v58, %v1553_v6  ;;  %v1551_v12 = vmul.f32 1.6732632, %v2910_v50  ;;  %v1535_v34 = vmul.f32 1.6732632, %v4383_v23  ;;  %v1569_v11 = vsel %vm1377_vm14, %v4256_v55, %v1537_v17  ;;  %v4688_v21 = vld [vmem:[#allocation17_spill] sm:$0xff]  ;;  %v4689_v8 = vld [vmem:[#allocation14_spill] sm:$0xff] }
 0x437   : > { %3025 = vmatprep.subr.mxu0 %v1621_v25  ;;  %3325 = vmatprep.subr.mxu1 %v1621_v25  ;;  %vm1392_vm7 = vcmp.gt.f32.partialorder %v4348_v2, 0.0  ;;  %v1618_v52 = vmul.f32 1.050701, %v1586_v56  ;;  %v1602_v26 = vmul.f32 1.050701, %v1570_v54  ;;  %v2907_v58 = vadd.f32 -1.0, %v4435_v24 }
 0x438   : > { %3026 = vmatpush3.msra.mxu0 %v1605_v60  ;;  %3341 = vmatpush3.msra.mxu1 %v1605_v60  ;;  %v1584_v33 = vsel %vm1392_vm7, %v4348_v2, %v1552_v4  ;;  %v1550_v32 = vmul.f32 1.6732632, %v2909_v30  ;;  %v1534_v27 = vmul.f32 1.6732632, %v4371_v40  ;;  %v1568_v23 = vsel %vm1376_vm0, %v4243_v47, %v1536_v63  ;;  %v4684_v24 = vld [vmem:[#allocation15_spill] sm:$0xff]  ;;  %v1627_v6 = vld [vmem:[#allocation5 + $0x20] sm:$0xff] }
 0x439   : > { %3027 = vmatprep.subr.mxu0 %v1620_v31  ;;  %3326 = vmatprep.subr.mxu1 %v1620_v31  ;;  %vm1391_vm8 = vcmp.gt.f32.partialorder %v4356_v61, 0.0  ;;  %v1617_v55 = vmul.f32 1.050701, %v1585_v19  ;;  %v1601_v43 = vmul.f32 1.050701, %v1569_v11  ;;  %v2906_v14 = vadd.f32 -1.0, %v3564_v62 }
 0x43a   : > { %3028 = vmatpush3.msra.mxu0 %v1604_v28  ;;  %3342 = vmatpush3.msra.mxu1 %v1604_v28  ;;  %v1583_v46 = vsel %vm1391_vm8, %v4356_v61, %v1551_v12  ;;  %v1549_v2 = vmul.f32 1.6732632, %v2908_v37  ;;  %v1533_v48 = vmul.f32 1.6732632, %v4379_v20  ;;  %v1567_v40 = vsel %vm1375_vm2, %v4246_v49, %v1535_v34  ;;  %v1635_v50 = vld [vmem:[#allocation5 + $0x140] sm:$0xff]  ;;  %v1630_v17 = vld [vmem:[#allocation5 + $0x70] sm:$0xff] }
 0x43b   : > { %3029 = vmatprep.subr.mxu0 %v1619_v3  ;;  %3327 = vmatprep.subr.mxu1 %v1619_v3  ;;  %vm1390_vm9 = vcmp.gt.f32.partialorder %v4363_v9, 0.0  ;;  %v1616_v47 = vmul.f32 1.050701, %v1584_v33  ;;  %vm1374_vm10 = vcmp.gt.f32.partialorder %v4236_v7, 0.0  ;;  %v1600_v45 = vmul.f32 1.050701, %v1568_v23 }
 0x43c   : > { %3030 = vmatpush3.msra.mxu0 %v1603_v38  ;;  %3343 = vmatpush3.msra.mxu1 %v1603_v38  ;;  %v1582_v61 = vsel %vm1390_vm9, %v4363_v9, %v1550_v32  ;;  %v1548_v22 = vmul.f32 1.6732632, %v2907_v58  ;;  %v1532_v44 = vmul.f32 1.6732632, %v4359_v0  ;;  %v1566_v20 = vsel %vm1374_vm10, %v4236_v7, %v1534_v27  ;;  %v4686_v0 = vld [vmem:[#allocation16_spill] sm:$0xff]  ;;  %v1638_v13 = vld [vmem:[#allocation5 + $0x190] sm:$0xff]  ;;  %v1669_v27 = vpop.permute.xlu0 %1668 }
 0x43d   : > { %3031 = vmatprep.subr.mxu0 %v1618_v52  ;;  %3328 = vmatprep.subr.mxu1 %v1618_v52  ;;  %vm1389_vm12 = vcmp.gt.f32.partialorder %v4683_v35, 0.0  ;;  %v1615_v49 = vmul.f32 1.050701, %v1583_v46  ;;  %vm1373_vm13 = vcmp.gt.f32.partialorder %v4684_v24, 0.0  ;;  %v1599_v18 = vmul.f32 1.050701, %v1567_v40 }
 0x43e   : > { %3032 = vmatpush3.msra.mxu0 %v1602_v26  ;;  %3344 = vmatpush3.msra.mxu1 %v1602_v26  ;;  %v1581_v16 = vsel %vm1389_vm12, %v4683_v35, %v1549_v2  ;;  %v1547_v42 = vmul.f32 1.6732632, %v2906_v14  ;;  %v1531_v9 = vmul.f32 1.6732632, %v4685_v53  ;;  %v1565_v59 = vsel %vm1373_vm13, %v4684_v24, %v1533_v48  ;;  %v1629_v31 = vld [vmem:[#allocation5 + $0x68] sm:$0xff]  ;;  %v1632_v56 = vld [vmem:[#allocation5 + $0xb8] sm:$0xff]  ;;  %v1673_v26 = vpop.permute.xlu1 %1672 }
 0x43f   : > { %3033 = vmatprep.subr.mxu0 %v1617_v55  ;;  %3329 = vmatprep.subr.mxu1 %v1617_v55  ;;  %vm1388_vm14 = vcmp.gt.f32.partialorder %v4686_v0, 0.0  ;;  %v1614_v7 = vmul.f32 1.050701, %v1582_v61  ;;  %vm1372_vm15 = vcmp.gt.f32.partialorder %v4687_v39, 0.0  ;;  %v1598_v1 = vmul.f32 1.050701, %v1566_v20 }
 0x440   : > { %3034 = vmatpush3.msra.mxu0 %v1601_v43  ;;  %3345 = vmatpush3.msra.mxu1 %v1601_v43  ;;  %v1580_v51 = vsel %vm1388_vm14, %v4686_v0, %v1548_v22  ;;  %v1564_v15 = vsel %vm1372_vm15, %v4687_v39, %v1532_v44  ;;  %vm1387_vm0 = vcmp.gt.f32.partialorder %v4688_v21, 0.0  ;;  %v1613_v10 = vmul.f32 1.050701, %v1581_v16  ;;  %v1637_v28 = vld [vmem:[#allocation5 + $0x188] sm:$0xff]  ;;  %v1640_v4 = vld [vmem:[#allocation5 + $0x1d8] sm:$0xff]  ;;  %v1631_v30 = vld [vmem:[#allocation5 + $0xb0] sm:$0xff] }
 0x441   : > { %3035 = vmatprep.subr.mxu0 %v1616_v47  ;;  %3330 = vmatprep.subr.mxu1 %v1616_v47  ;;  %vm1371_vm1 = vcmp.gt.f32.partialorder %v4689_v8, 0.0  ;;  %v1597_v5 = vmul.f32 1.050701, %v1565_v59  ;;  %v1579_v41 = vsel %vm1387_vm0, %v4688_v21, %v1547_v42  ;;  %v1612_v25 = vmul.f32 1.050701, %v1580_v51  ;;  %v1639_v63 = vld [vmem:[#allocation5 + $0x1d0] sm:$0xff] }
 0x442   : > { %3036 = vmatpush3.msra.mxu0 %v1600_v45  ;;  %3346 = vmatpush3.msra.mxu1 %v1600_v45  ;;  %v1563_v36 = vsel %vm1371_vm1, %v4689_v8, %v1531_v9  ;;  %v1596_v57 = vmul.f32 1.050701, %v1564_v15  ;;  %v1611_v60 = vmul.f32 1.050701, %v1579_v41  ;;  %v1634_v54 = vld [vmem:[#allocation5 + $0x100] sm:$0xff]  ;;  %v1633_v62 = vld [vmem:[#allocation5 + $0xf8] sm:$0xff]  ;;  %v1665_v33 = vpop.permute.xlu1 %1664  ;;  %v1657_v45 = vpop.permute.xlu0 %1656 }
 0x443   : > { %3037 = vmatprep.subr.mxu0 %v1615_v49  ;;  %3331 = vmatprep.subr.mxu1 %v1615_v49  ;;  %v1595_v29 = vmul.f32 1.050701, %v1563_v36  ;;  %v1642_v3 = vld [vmem:[#allocation5 + $0x220] sm:$0xff]  ;;  %v1641_v38 = vld [vmem:[#allocation5 + $0x218] sm:$0xff]  ;;  %v1844_v19 = vld [vmem:[#allocation5 + $0x30] sm:$0xff]  ;;  %v3809_v12 = vmov 5  }
 0x444   : > { %3038 = vmatpush3.msra.mxu0 %v1599_v18  ;;  %3347 = vmatpush3.msra.mxu1 %v1599_v18  ;;  %v3597_v37 = vld [vmem:[%s4648_s3 + $0x10] sm:$0xff]  ;;  %v3598_v34 = vld [vmem:[%s4648_s3 + $0x18] sm:$0xff]  ;;  %v4510_v11 = vld [vmem:[%s4648_s3 + $0x8] sm:$0xff]  ;;  %vm3812_vm1 = vmmov 0  }
 0x445   : > { %3039 = vmatprep.subr.mxu0 %v1614_v7  ;;  %3332 = vmatprep.subr.mxu1 %v1614_v7  ;;  %v4516_v52 = vld [vmem:[%s4648_s3] sm:$0xff] }
 0x446   : > { %3040 = vmatpush3.msra.mxu0 %v1598_v1  ;;  %3348 = vmatpush3.msra.mxu1 %v1598_v1  ;;  %v1661_v43 = vpop.permute.xlu1 %1660  ;;  %v1649_v7 = vpop.permute.xlu0 %1648 }
 0x447   : > { %3041 = vmatprep.subr.mxu0 %v1613_v10  ;;  %3333 = vmatprep.subr.mxu1 %v1613_v10 }
 0x448   : > { %3042 = vmatpush3.msra.mxu0 %v1597_v5  ;;  %3349 = vmatpush3.msra.mxu1 %v1597_v5 }
 0x449   : > { %3043 = vmatprep.subr.mxu0 %v1612_v25  ;;  %3334 = vmatprep.subr.mxu1 %v1612_v25 }
 0x44a   : > { %3044 = vmatpush3.msra.mxu0 %v1596_v57  ;;  %3350 = vmatpush3.msra.mxu1 %v1596_v57  ;;  %v1653_v44 = vpop.permute.xlu1 %1652 }
 0x44b   : > { %3045 = vmatprep.subr.mxu0 %v1611_v60  ;;  %3335 = vmatprep.subr.mxu1 %v1611_v60 }
 0x44c   : > { %3046 = vmatpush3.msra.mxu0 %v1595_v29  ;;  %3351 = vmatpush3.msra.mxu1 %v1595_v29 }
 0x44d   : > { %1740 = vmatmul.mubr.f32.vlgmr.msra.gmra.mxu0 %v1627_v6  ;;  %1760 = vmatmul.mubr.f32.vlgmr.msra.gmra.mxu1 %v1635_v50 }
 0x44e   : > { %1744 = vmatprep.mubr.f32.mxu0 %v1630_v17  ;;  %1764 = vmatprep.mubr.f32.mxu1 %v1638_v13  ;;  %v1645_v8 = vpop.permute.xlu1 %1644 }
 0x44f   : > { %3484 = vset.pattern.permute.xlu1 %v3809_v12  ;;  %3483 = vset.pattern.permute.xlu0 %v3809_v12 }
 0x450   : > { %1857 = vperm.xlu1 %3484, %v3597_v37   ;;  %1861 = vperm.xlu0 %3483, %v3598_v34  }
 0x451   : > { %1745 = vmatmul.mubr.f32.gmra.mxu0 %v1629_v31  ;;  %1765 = vmatmul.mubr.f32.gmra.mxu1 %v1637_v28 }
 0x452   : > { %1749 = vmatprep.mubr.f32.mxu0 %v1632_v56  ;;  %1769 = vmatprep.mubr.f32.mxu1 %v1640_v4 }
 0x454   : > { %1853 = vperm.xlu1 %3484, %v4510_v11   ;;  %1849 = vperm.xlu0 %3483, %v4516_v52  }
 0x455   : > { %1750 = vmatmul.mubr.f32.gmra.mxu0 %v1631_v30  ;;  %1770 = vmatmul.mubr.f32.gmra.mxu1 %v1639_v63 }
 0x456   : > { %1754 = vmatprep.mubr.f32.mxu0 %v1634_v54  ;;  %1774 = vmatprep.mubr.f32.mxu1 %v1642_v3 }
 0x459   : > { %1755 = vmatmul.mubr.f32.gmra.mxu0 %v1633_v62  ;;  %1775 = vmatmul.mubr.f32.gmra.mxu1 %v1641_v38 }
 0x45a   : > { %3259 = vmatprep.mubr.msk.f32.mxu0 %vm1049_vm11, %v1844_v19 }
 0x50d   : > { %v3047_v32 = vpop.f32.mrf.mxu0  ;;  %v3059_v58 = vpop.f32.mrf.mxu1 }
 0x50f   : > { %v3048_v23 = vpop.f32.mrf.mxu0  ;;  %v3060_v55 = vpop.f32.mrf.mxu1 }
 0x510   : > { %v3061_v14 = vadd.f32 %v3060_v55, %v3059_v58  ;;  %v3049_v39 = vadd.f32 %v3048_v23, %v3047_v32 }
 0x511   : > { %v3050_v46 = vpop.f32.mrf.mxu0  ;;  %v3062_v2 = vpop.f32.mrf.mxu1 }
 0x512   : > { %v4521_v35 = vadd.f32 %v3061_v14, %v1661_v43  ;;  %v4529_v6 = vadd.f32 %v3049_v39, %v1645_v8  ;;  %v1847_v8 = vld [vmem:[#allocation5 + $0x108] sm:$0xff] }
 0x513   : > { %v3051_v48 = vpop.f32.mrf.mxu0  ;;  %v3063_v40 = vpop.f32.mrf.mxu1 }
 0x514   : > { %v3064_v47 = vadd.f32 %v3063_v40, %v3062_v2  ;;  %v3052_v53 = vadd.f32 %v3051_v48, %v3050_v46  ;;  %v1792_v1 = vmin.f32 %v4521_v35, 0.0  ;;  %v1788_v4 = vmin.f32 %v4529_v6, 0.0 }
 0x515   : > { %v3053_v61 = vpop.f32.mrf.mxu0  ;;  %v3065_v22 = vpop.f32.mrf.mxu1  ;;  %vm1784_vm7 = vcmp.gt.f32.partialorder %v4521_v35, 0.0  ;;  %vm1780_vm12 = vcmp.gt.f32.partialorder %v4529_v6, 0.0 }
 0x516   : > { %v4519_v20 = vadd.f32 %v3064_v47, %v1665_v33  ;;  %v4527_v36 = vadd.f32 %v3052_v53, %v1649_v7  ;;  %v1804_v29 = vmul.f32 1.442695, %v1792_v1  ;;  %v1796_v3 = vmul.f32 1.442695, %v1788_v4 }
 0x517   : > { %v3054_v49 = vpop.f32.mrf.mxu0  ;;  %v3066_v24 = vpop.f32.mrf.mxu1 }
 0x518   : > { %v1793_v18 = vmin.f32 %v4519_v20, 0.0  ;;  %v3055_v16 = vadd.f32 %v3054_v49, %v3053_v61  ;;  %v3067_v42 = vadd.f32 %v3066_v24, %v3065_v22  ;;  %v1789_v31 = vmin.f32 %v4527_v36, 0.0 }
 0x519   : > { %v3056_v9 = vpop.f32.mrf.mxu0  ;;  %v3068_v59 = vpop.f32.mrf.mxu1  ;;  %vm1785_vm5 = vcmp.gt.f32.partialorder %v4519_v20, 0.0  ;;  %vm1781_vm10 = vcmp.gt.f32.partialorder %v4527_v36, 0.0 }
 0x51a   : > { %v1772_v0 = vadd.f32 %v3067_v42, %v1669_v27  ;;  %v4525_v51 = vadd.f32 %v3055_v16, %v1653_v44  ;;  %v1806_v10 = vmul.f32 1.442695, %v1793_v18  ;;  %v1798_v54 = vmul.f32 1.442695, %v1789_v31 }
 0x51b   : > { %v3057_v15 = vpop.f32.mrf.mxu0  ;;  %v3069_v21 = vpop.f32.mrf.mxu1 }
 0x51c   : > { %v1794_v5 = vmin.f32 %v1772_v0, 0.0  ;;  %v3058_v41 = vadd.f32 %v3057_v15, %v3056_v9  ;;  %v3070_v25 = vadd.f32 %v3069_v21, %v3068_v59  ;;  %v1790_v50 = vmin.f32 %v4525_v51, 0.0  ;;  %v1845_v21 = vld [vmem:[#allocation5 + $0x78] sm:$0xff] }
 0x51d   : > { %3565 = vpow2.f32 %v1806_v10  ;;  %vm1786_vm4 = vcmp.gt.f32.partialorder %v1772_v0, 0.0  ;;  %vm1782_vm9 = vcmp.gt.f32.partialorder %v4525_v51, 0.0  ;;  %v1846_v10 = vld [vmem:[#allocation5 + $0xc0] sm:$0xff] }
 0x51e   : > { %v1808_v57 = vmul.f32 1.442695, %v1794_v5  ;;  %v1757_v60 = vadd.f32 %v3058_v41, %v1657_v45  ;;  %v1777_v17 = vadd.f32 %v3070_v25, %v1673_v26  ;;  %v1800_v30 = vmul.f32 1.442695, %v1790_v50  ;;  %v1993_v5 = vld [vmem:[#allocation5 + $0x38] sm:$0xff]  ;;  %v1862_v25 = vpop.permute.xlu0 %1861 }
 0x51f   : > { %v3810_v41 = vmov 6  }
 0x520   : > { %v1791_v13 = vmin.f32 %v1757_v60, 0.0  ;;  %3567 = vpow2.f32 %v1808_v57  ;;  %v1795_v28 = vmin.f32 %v1777_v17, 0.0  ;;  %vm1787_vm2 = vcmp.gt.f32.partialorder %v1777_v17, 0.0  ;;  %3485 = vset.pattern.permute.xlu1 %v3810_v41  ;;  %3486 = vset.pattern.permute.xlu0 %v3810_v41 }
 0x521   : > { %3569 = vpow2.f32 %v1804_v29  ;;  %vm1783_vm8 = vcmp.gt.f32.partialorder %v1757_v60, 0.0  ;;  %2000 = vperm.xlu1 %3485, %v4510_v11   ;;  %1996 = vperm.xlu0 %3486, %v4516_v52  }
 0x522   : > { %v1802_v56 = vmul.f32 1.442695, %v1791_v13  ;;  %v1810_v63 = vmul.f32 1.442695, %v1795_v28  ;;  %v1850_v29 = vpop.permute.xlu0 %1849 }
 0x524   : > { %3571 = vpow2.f32 %v1802_v56 }
 0x525   : > { %3573 = vpow2.f32 %v1810_v63 }
 0x526   : > { %3575 = vpow2.f32 %v1800_v30 }
 0x527   : > { %3577 = vpow2.f32 %v1798_v54 }
 0x528   : > { %3579 = vpow2.f32 %v1796_v3 }
 0x52a   : > { %v3566_v62 = vpop.eup %3565 }
 0x52b   : > { %v2927_v34 = vadd.f32 -1.0, %v3566_v62 }
 0x52d   : > { %v3568_v38 = vpop.eup %3567  ;;  %v1825_v55 = vmul.f32 1.6732632, %v2927_v34 }
 0x52e   : > { %v2928_v19 = vadd.f32 -1.0, %v3568_v38  ;;  %v3570_v12 = vpop.eup %3569 }
 0x52f   : > { %v2926_v58 = vadd.f32 -1.0, %v3570_v12  ;;  %v1833_v61 = vsel %vm1785_vm5, %v4519_v20, %v1825_v55 }
 0x530   : > { %v1826_v32 = vmul.f32 1.6732632, %v2928_v19  ;;  %v1841_v42 = vmul.f32 1.050701, %v1833_v61  ;;  %v1994_v61 = vld [vmem:[#allocation5 + $0x80] sm:$0xff] }
 0x531   : > { %v3572_v37 = vpop.eup %3571  ;;  %v1824_v48 = vmul.f32 1.6732632, %v2926_v58 }
 0x532   : > { %v3574_v26 = vpop.eup %3573  ;;  %v2925_v43 = vadd.f32 -1.0, %v3572_v37  ;;  %v1834_v14 = vsel %vm1786_vm4, %v1772_v0, %v1826_v32 }
 0x533   : > { %v2929_v33 = vadd.f32 -1.0, %v3574_v26  ;;  %v3576_v27 = vpop.eup %3575  ;;  %v1842_v49 = vmul.f32 1.050701, %v1834_v14  ;;  %v1832_v24 = vsel %vm1784_vm7, %v4521_v35, %v1824_v48 }
 0x534   : > { %v3578_v46 = vpop.eup %3577  ;;  %v2924_v40 = vadd.f32 -1.0, %v3576_v27  ;;  %v1823_v22 = vmul.f32 1.6732632, %v2925_v43  ;;  %v1840_v59 = vmul.f32 1.050701, %v1832_v24 }
 0x535   : > { %v1827_v23 = vmul.f32 1.6732632, %v2929_v33  ;;  %v3580_v47 = vpop.eup %3579  ;;  %v2923_v44 = vadd.f32 -1.0, %v3578_v46 }
 0x536   : > { %v1822_v18 = vmul.f32 1.6732632, %v2924_v40  ;;  %v2922_v16 = vadd.f32 -1.0, %v3580_v47  ;;  %v1831_v53 = vsel %vm1783_vm8, %v1757_v60, %v1823_v22  ;;  %v3811_v22 = vmov 0.0  }
 0x537   : > { %v1835_v2 = vsel %vm1787_vm2, %v1777_v17, %v1827_v23  ;;  %v1821_v9 = vmul.f32 1.6732632, %v2923_v44  ;;  %v1839_v35 = vmul.f32 1.050701, %v1831_v53  ;;  %3276 = vmatprep.subr.mxu1 %v3811_v22  ;;  %3280 = vmatprep.mubr.msk.f32.mxu1 %vm3812_vm1, %v3811_v22  ;;  %v2101_v44 = vld [vmem:[%s4648_s3] sm:$0x1] }
 0x538   : > { %v1843_v45 = vmul.f32 1.050701, %v1835_v2  ;;  %v1830_v20 = vsel %vm1782_vm9, %v4525_v51, %v1822_v18  ;;  %v1820_v0 = vmul.f32 1.6732632, %v2922_v16 }
 0x539   : > { %v1829_v7 = vsel %vm1781_vm10, %v4527_v36, %v1821_v9  ;;  %v1838_v39 = vmul.f32 1.050701, %v1830_v20  ;;  %v1858_v36 = vpop.permute.xlu1 %1857 }
 0x53a   : > { %3243 = vmatprep.subr.mxu0 %v1843_v45  ;;  %v1828_v1 = vsel %vm1780_vm12, %v4529_v6, %v1820_v0  ;;  %v1837_v15 = vmul.f32 1.050701, %v1829_v7 }
 0x53b   : > { %3244 = vmatpush3.msra.mxu0 %v1843_v45  ;;  %v1836_v51 = vmul.f32 1.050701, %v1828_v1 }
 0x53c   : > { %3245 = vmatprep.subr.mxu0 %v1842_v49 }
 0x53d   : > { %3246 = vmatpush3.msra.mxu0 %v1842_v49  ;;  %v1854_v57 = vpop.permute.xlu1 %1853  ;;  %v3813_v49 = vmov 7  }
 0x53e   : > { %3247 = vmatprep.subr.mxu0 %v1841_v42  ;;  %3487 = vset.pattern.permute.xlu1 %v3813_v49 }
 0x53f   : > { %3248 = vmatpush3.msra.mxu0 %v1841_v42  ;;  %3488 = vset.pattern.permute.xlu0 %v3813_v49 }
 0x540   : > { %3249 = vmatprep.subr.mxu0 %v1840_v59  ;;  %2104 = vperm.xlu1 %3487, %v2101_v44   ;;  %v3814_v44 = vmov 1966171168  }
 0x541   : > { %3250 = vmatpush3.msra.mxu0 %v1840_v59  ;;  %v2294_v49 = vunpack.c.l.s4 %v3814_v44 }
 0x542   : > { %3251 = vmatprep.subr.mxu0 %v1839_v35 }
 0x543   : > { %3252 = vmatpush3.msra.mxu0 %v1839_v35 }
 0x544   : > { %3253 = vmatprep.subr.mxu0 %v1838_v39 }
 0x545   : > { %3254 = vmatpush3.msra.mxu0 %v1838_v39 }
 0x546   : > { %3255 = vmatprep.subr.mxu0 %v1837_v15 }
 0x547   : > { %3256 = vmatpush3.msra.mxu0 %v1837_v15 }
 0x548   : > { %3257 = vmatprep.subr.mxu0 %v1836_v51 }
 0x549   : > { %3258 = vmatpush3.msra.mxu0 %v1836_v51 }
 0x54a   : > { %3260 = vmatmul.mubr.msk.f32.vlgmr.msra.gmra.mxu0 %vm1049_vm11, %v1845_v21 }
 0x54b   : > { %3262 = vmatprep.mubr.msk.f32.mxu0 %vm1049_vm11, %v1846_v10 }
 0x54e   : > { %3263 = vmatmul.mubr.msk.f32.gmra.mxu0 %vm1049_vm11, %v1847_v8 }
 0x54f   : > { %3273 = vmatprep.mubr.msk.f32.mxu0 %vm695_vm6, %v1993_v5 }
 0x59c   : > { %v2001_v24 = vpop.permute.xlu1 %2000  ;;  %v1997_v16 = vpop.permute.xlu0 %1996 }
 0x60a   : > { %v3261_v60 = vpop.f32.mrf.mxu0 }
 0x60b   : > { %v1948_v6 = vadd.f32 %v3261_v60, %v1854_v57  ;;  %v2217_v57 = vld [vmem:[%s3975_s14 + $0xf0] sm:$0xff]  ;;  %v2216_v60 = vld [vmem:[%s3975_s14 + $0xe8] sm:$0xff] }
 0x60c   : > { %v1942_v50 = vpop.f32.mrf.mxu0 }
 0x60d   : > { %v1966_v17 = vmin.f32 %v1948_v6, 0.0  ;;  %v1943_v13 = vadd.f32 %v1942_v50, %v1850_v29  ;;  %vm1962_vm14 = vcmp.gt.f32.partialorder %v1948_v6, 0.0  ;;  %v2215_v29 = vld [vmem:[%s3975_s14 + $0xe0] sm:$0xff]  ;;  %v2213_v50 = vld [vmem:[%s3975_s14 + $0xd0] sm:$0xff] }
 0x60e   : > { %v3264_v31 = vpop.f32.mrf.mxu0 }
 0x60f   : > { %v1971_v28 = vmul.f32 1.442695, %v1966_v17  ;;  %v1965_v56 = vmin.f32 %v1943_v13, 0.0  ;;  %v1958_v4 = vadd.f32 %v3264_v31, %v1862_v25  ;;  %vm1961_vm0 = vcmp.gt.f32.partialorder %v1943_v13, 0.0  ;;  %v2218_v25 = vld [vmem:[%s3975_s14 + $0xf8] sm:$0xff]  ;;  %v2212_v17 = vld [vmem:[%s3975_s14 + $0xc8] sm:$0xff] }
 0x610   : > { %v1952_v30 = vpop.f32.mrf.mxu0  ;;  %v2210_v31 = vld [vmem:[%s3975_s14 + $0xb8] sm:$0xff] }
 0x611   : > { %v1969_v63 = vmul.f32 1.442695, %v1965_v56  ;;  %v1968_v54 = vmin.f32 %v1958_v4, 0.0  ;;  %3581 = vpow2.f32 %v1971_v28  ;;  %v1953_v11 = vadd.f32 %v1952_v30, %v1858_v36  ;;  %v2100_v36 = vld [vmem:[#allocation5 + $0x40] ss:$0 sm:$0xff]  ;;  %v2209_v28 = vld [vmem:[%s3975_s14 + $0xb0] sm:$0xff] }
 0x612   : > { %vm1964_vm13 = vcmp.gt.f32.partialorder %v1958_v4, 0.0  ;;  %v2208_v56 = vld [vmem:[%s3975_s14 + $0xa8] sm:$0xff]  ;;  %v2206_v30 = vld [vmem:[%s3975_s14 + $0x98] sm:$0xff] }
 0x613   : > { %v1975_v3 = vmul.f32 1.442695, %v1968_v54  ;;  %3583 = vpow2.f32 %v1969_v63  ;;  %v1967_v52 = vmin.f32 %v1953_v11, 0.0  ;;  %vm1963_vm15 = vcmp.gt.f32.partialorder %v1953_v11, 0.0  ;;  %v2205_v63 = vld [vmem:[%s3975_s14 + $0x90] sm:$0xff]  ;;  %v2204_v54 = vld [vmem:[%s3975_s14 + $0x88] sm:$0xff] }
 0x615   : > { %3585 = vpow2.f32 %v1975_v3  ;;  %v1973_v62 = vmul.f32 1.442695, %v1967_v52  ;;  %v2202_v3 = vld [vmem:[%s3975_s14 + $0x78] sm:$0xff]  ;;  %v2201_v52 = vld [vmem:[%s3975_s14 + $0x70] sm:$0xff] }
 0x617   : > { %3587 = vpow2.f32 %v1973_v62  ;;  %v2200_v62 = vld [vmem:[%s3975_s14 + $0x68] sm:$0xff] }
 0x61e   : > { %v3582_v38 = vpop.eup %3581 }
 0x61f   : > { %v2935_v37 = vadd.f32 -1.0, %v3582_v38  ;;  %v2199_v38 = vld [vmem:[%s3975_s14 + $0x60] sm:$0xff] }
 0x620   : > { %v3584_v19 = vpop.eup %3583 }
 0x621   : > { %v2934_v26 = vadd.f32 -1.0, %v3584_v19  ;;  %v1982_v27 = vmul.f32 1.6732632, %v2935_v37  ;;  %v2198_v19 = vld [vmem:[%s3975_s14 + $0x58] sm:$0xff]  ;;  %v2196_v37 = vld [vmem:[%s3975_s14 + $0x48] sm:$0xff] }
 0x622   : > { %v3586_v12 = vpop.eup %3585 }
 0x623   : > { %v2937_v34 = vadd.f32 -1.0, %v3586_v12  ;;  %v1981_v46 = vmul.f32 1.6732632, %v2934_v26  ;;  %v1986_v14 = vsel %vm1962_vm14, %v1948_v6, %v1982_v27  ;;  %v2214_v6 = vld [vmem:[%s3975_s14 + $0xd8] sm:$0xff]  ;;  %v2197_v12 = vld [vmem:[%s3975_s14 + $0x50] sm:$0xff] }
 0x624   : > { %v3588_v33 = vpop.eup %3587  ;;  %v1990_v47 = vmul.f32 1.050701, %v1986_v14  ;;  %v2194_v26 = vld [vmem:[%s3975_s14 + $0x38] sm:$0xff] }
 0x625   : > { %v1984_v32 = vmul.f32 1.6732632, %v2937_v34  ;;  %v2936_v58 = vadd.f32 -1.0, %v3588_v33  ;;  %v1985_v40 = vsel %vm1961_vm0, %v1943_v13, %v1981_v46  ;;  %v2211_v13 = vld [vmem:[%s3975_s14 + $0xc0] sm:$0xff]  ;;  %v2193_v33 = vld [vmem:[%s3975_s14 + $0x30] sm:$0xff]  ;;  %v2190_v27 = vld [vmem:[%s3975_s14 + $0x18] sm:$0xff]  ;;  %v2105_v46 = vpop.permute.xlu1 %2104 }
 0x626   : > { %v1989_v45 = vmul.f32 1.050701, %v1985_v40  ;;  %v2195_v34 = vld [vmem:[%s3975_s14 + $0x40] sm:$0xff] }
 0x627   : > { %v1988_v23 = vsel %vm1964_vm13, %v1958_v4, %v1984_v32  ;;  %v1983_v43 = vmul.f32 1.6732632, %v2936_v58  ;;  %v2207_v4 = vld [vmem:[%s3975_s14 + $0xa0] sm:$0xff]  ;;  %v2192_v32 = vld [vmem:[%s3975_s14 + $0x28] sm:$0xff] }
 0x628   : > { %v1992_v55 = vmul.f32 1.050701, %v1988_v23  ;;  %v2191_v58 = vld [vmem:[%s3975_s14 + $0x20] sm:$0xff]  ;;  %v2189_v23 = vld [vmem:[%s3975_s14 + $0x10] sm:$0xff] }
 0x629   : > { %v1987_v2 = vsel %vm1963_vm15, %v1953_v11, %v1983_v43  ;;  %v2203_v11 = vld [vmem:[%s3975_s14 + $0x80] sm:$0xff] }
 0x62a   : > { %3265 = vmatprep.subr.mxu0 %v1992_v55  ;;  %v1991_v48 = vmul.f32 1.050701, %v1987_v2  ;;  %v2187_v43 = vld [vmem:[%s3975_s14] sm:$0xff] }
 0x62b   : > { %3266 = vmatpush3.msra.mxu0 %v1992_v55  ;;  %v2188_v55 = vld [vmem:[%s3975_s14 + $0x8] sm:$0xff] }
 0x62c   : > { %3267 = vmatprep.subr.mxu0 %v1991_v48 }
 0x62d   : > { %3268 = vmatpush3.msra.mxu0 %v1991_v48 }
 0x62e   : > { %3269 = vmatprep.subr.mxu0 %v1990_v47 }
 0x62f   : > { %3270 = vmatpush3.msra.mxu0 %v1990_v47 }
 0x630   : > { %3271 = vmatprep.subr.mxu0 %v1989_v45 }
 0x631   : > { %3272 = vmatpush3.msra.mxu0 %v1989_v45 }
 0x632   : > { %3274 = vmatmul.mubr.msk.f32.vlgmr.msra.gmra.mxu0 %vm695_vm6, %v1994_v61  ;;  %2219 = vmatprep.subr.mxu0 %v2218_v25 }
 0x633   : > { %2283 = vmatprep.mubr.f32.mxu0 %v3811_v22  ;;  %2220 = vmatpush1.msra.mxu0 %v2217_v57 }
 0x634   : > { %2221 = vmatprep.subr.mxu0 %v2216_v60 }
 0x635   : > { %2222 = vmatpush1.msra.mxu0 %v2215_v29 }
 0x636   : > { %2223 = vmatprep.subr.mxu0 %v2214_v6 }
 0x637   : > { %2224 = vmatpush1.msra.mxu0 %v2213_v50 }
 0x638   : > { %2225 = vmatprep.subr.mxu0 %v2212_v17 }
 0x639   : > { %2226 = vmatpush1.msra.mxu0 %v2211_v13 }
 0x63a   : > { %2227 = vmatprep.subr.mxu0 %v2210_v31 }
 0x63b   : > { %2228 = vmatpush1.msra.mxu0 %v2209_v28 }
 0x63c   : > { %2229 = vmatprep.subr.mxu0 %v2208_v56 }
 0x63d   : > { %2230 = vmatpush1.msra.mxu0 %v2207_v4 }
 0x63e   : > { %2231 = vmatprep.subr.mxu0 %v2206_v30 }
 0x63f   : > { %2232 = vmatpush1.msra.mxu0 %v2205_v63 }
 0x640   : > { %2233 = vmatprep.subr.mxu0 %v2204_v54 }
 0x641   : > { %2234 = vmatpush1.msra.mxu0 %v2203_v11 }
 0x642   : > { %2235 = vmatprep.subr.mxu0 %v2202_v3 }
 0x643   : > { %2236 = vmatpush1.msra.mxu0 %v2201_v52 }
 0x644   : > { %2237 = vmatprep.subr.mxu0 %v2200_v62 }
 0x645   : > { %2238 = vmatpush1.msra.mxu0 %v2199_v38 }
 0x646   : > { %2239 = vmatprep.subr.mxu0 %v2198_v19 }
 0x647   : > { %2240 = vmatpush1.msra.mxu0 %v2197_v12 }
 0x648   : > { %2241 = vmatprep.subr.mxu0 %v2196_v37 }
 0x649   : > { %2242 = vmatpush1.msra.mxu0 %v2195_v34 }
 0x64a   : > { %2243 = vmatprep.subr.mxu0 %v2194_v26 }
 0x64b   : > { %2244 = vmatpush1.msra.mxu0 %v2193_v33 }
 0x64c   : > { %2245 = vmatprep.subr.mxu0 %v2192_v32 }
 0x64d   : > { %2246 = vmatpush1.msra.mxu0 %v2191_v58 }
 0x64e   : > { %2247 = vmatprep.subr.mxu0 %v2190_v27 }
 0x64f   : > { %2248 = vmatpush1.msra.mxu0 %v2189_v23 }
 0x650   : > { %2249 = vmatprep.subr.mxu0 %v2188_v55 }
 0x651   : > { %2250 = vmatpush1.msra.mxu0 %v2187_v43 }
 0x6f2   : > { %v3275_v18 = vpop.f32.mrf.mxu0 }
 0x6f3   : > { %v2081_v42 = vadd.f32 %v3275_v18, %v2001_v24  ;;  %v2296_v24 = vlaneseq  ;;  %v2295_v18 = vunpack.c.0.s8 %v2294_v49 }
 0x6f4   : > { %v2075_v53 = vpop.f32.mrf.mxu0 }
 0x6f5   : > { %v2087_v9 = vmin.f32 %v2081_v42, 0.0  ;;  %v2076_v59 = vadd.f32 %v2075_v53, %v1997_v16  ;;  %vm2085_vm2 = vcmp.gt.f32.partialorder %v2081_v42, 0.0  ;;  %v4587_v16 = vshrl.u32 %v2296_v24, 7 }
 0x6f6   : > { %vm2311_vm5 = vcmp.lt.s32.totalorder %v2296_v24, 256 }
 0x6f7   : > { %v2090_v20 = vmul.f32 1.442695, %v2087_v9  ;;  %v2086_v0 = vmin.f32 %v2076_v59, 0.0  ;;  %vm2084_vm4 = vcmp.gt.f32.partialorder %v2076_v59, 0.0  ;;  %v2298_v53 = vsub.s32 %v2295_v18, %v4587_v16 }
 0x6f9   : > { %3589 = vpow2.f32 %v2090_v20  ;;  %v2088_v35 = vmul.f32 1.442695, %v2086_v0  ;;  %v2186_v0 = vld [vmem:[#allocation2] sm:$0x3] }
 0x6fb   : > { %3591 = vpow2.f32 %v2088_v35 }
 0x706   : > { %v3590_v7 = vpop.eup %3589 }
 0x707   : > { %v2941_v39 = vadd.f32 -1.0, %v3590_v7 }
 0x708   : > { %v3592_v1 = vpop.eup %3591 }
 0x709   : > { %v2095_v15 = vmul.f32 1.6732632, %v2941_v39  ;;  %v2940_v51 = vadd.f32 -1.0, %v3592_v1 }
 0x70b   : > { %v2097_v21 = vsel %vm2085_vm2, %v2081_v42, %v2095_v15  ;;  %v2094_v10 = vmul.f32 1.6732632, %v2940_v51 }
 0x70c   : > { %v2099_v8 = vmul.f32 1.050701, %v2097_v21 }
 0x70d   : > { %v2096_v5 = vsel %vm2084_vm4, %v2076_v59, %v2094_v10 }
 0x70e   : > { %v2098_v41 = vmul.f32 1.050701, %v2096_v5  ;;  %3277 = vmatpush3.msra.mxu1 %v2099_v8 }
 0x70f   : > { %3278 = vmatprep.subr.mxu1 %v3811_v22 }
 0x710   : > { %3279 = vmatpush3.msra.mxu1 %v2098_v41 }
 0x711   : > { %3281 = vmatmul.mubr.msk.f32.vlgmr.msra.gmra.mxu1 %vm509_vm3, %v2100_v36 }
 0x7d1   : > { %v2176_v2 = vpop.f32.mrf.mxu1 }
 0x7d2   : > { %v2177_v14 = vadd.f32 %v2176_v2, %v2105_v46 }
 0x7d3   : > { %v3282_v48 = vpop.f32.mrf.mxu1 }
 0x7d4   : > { %v2180_v40 = vsub.f32 0.0, %v2177_v14 }
 0x7d6   : > { %v2181_v47 = vmul.f32 1.442695, %v2180_v40 }
 0x7d8   : > { %3593 = vpow2.f32 %v2181_v47 }
 0x7e5   : > { %v3594_v45 = vpop.eup %3593 }
 0x7e6   : > { %v2183_v61 = vadd.f32 1.0, %v3594_v45 }
 0x7e8   : > { %3595 = vrcp.f32 %v2183_v61 }
 0x7f5   : > { %v3596_v22 = vpop.eup %3595 }
 0x7f6   : > { %2284 = vmatmul.mubr.f32.vlgmr.msra.gmra.mxu0 %v3596_v22 }
 0x8b6   : > { %v2285_v42 = vpop.f32.mrf.mxu0 }
 0x8b8   : > { %v2287_v9 = vpop.f32.mrf.mxu0 }
 0x8b9   : > { %v2292_v59 = vcombine.low %v2285_v42, %v2287_v9 }
 0x8bb   : > { %v2299_v20 = vrot.slane %v2292_v59, %v2298_v53 }
 0x8bd   : > { %v2306_v35 = vrot.slane %v2299_v20, %v2298_v53  ;;  %2317 = sbr.rel (%p2943_p1) target bundleno = 3169 (0xc61), region = 68 }
 0x8bf   : > { %v2308_v7 = vadd.f32 %v2306_v35, %v2186_v0 }
 0x8c1   : > { %2313 = vst.msk [vmem:[#allocation2] sm:$0x3] %vm2311_vm5, %v2308_v7 }
 0x8c2   : > { %v2350_v39 = vld [vmem:[#allocation7 + $0x3e0] sm:$0xff]  ;;  %v2359_v25 = vsub.s32 1, %v4587_v16  ;;  %v2355_v12 = vsub.s32 0, %v4587_v16  ;;  %v2448_v58 = vld [vmem:[#allocation7 + $0xe8] sm:$0xff]  ;;  %v3815_v27 = vmov 0.0   ;;  %vm3816_vm7 = vmmov 0  }
 0x8c3   : > { %v2334_v1 = vld [vmem:[#allocation7 + $0x1e0] sm:$0xff]  ;;  %3092 = vmatprep.subr.mxu0 %v2350_v39  ;;  %3283 = vmatprep.subr.mxu1 %v3815_v27  ;;  %v2447_v23 = vld [vmem:[#allocation7 + $0xc8] sm:$0xff]  ;;  %v2534_v9 = vld [vmem:[#allocation7 + $0x70] sm:$0xff]  ;;  %vm2699_vm9 = vcmask 0  }
 0x8c4   : > { %v2349_v15 = vld [vmem:[#allocation7 + $0x3c0] sm:$0xff]  ;;  %3093 = vmatpush3.msra.mxu0 %v2334_v1  ;;  %3299 = vmatprep.mubr.msk.f32.mxu1 %vm3816_vm7, %v3815_v27  ;;  %v2446_v55 = vld [vmem:[#allocation7 + $0xa8] sm:$0xff]  ;;  %v2533_v59 = vld [vmem:[#allocation7 + $0x50] sm:$0xff] }
 0x8c5   : > { %v2333_v51 = vld [vmem:[#allocation7 + $0x1c0] sm:$0xff]  ;;  %3094 = vmatprep.subr.mxu0 %v2349_v15  ;;  %3284 = vmatpush3.msra.mxu1 %v2448_v58  ;;  %v2445_v43 = vld [vmem:[#allocation7 + $0x88] sm:$0xff]  ;;  %v2532_v20 = vld [vmem:[#allocation7 + $0x30] sm:$0xff] }
 0x8c6   : > { %v2348_v21 = vld [vmem:[#allocation7 + $0x3a0] sm:$0xff]  ;;  %3095 = vmatpush3.msra.mxu0 %v2333_v51  ;;  %3285 = vmatprep.subr.mxu1 %v3815_v27  ;;  %v2444_v46 = vld [vmem:[#allocation7 + $0x68] sm:$0xff]  ;;  %v2531_v0 = vld [vmem:[#allocation7 + $0x10] sm:$0xff] }
 0x8c7   : > { %v2332_v10 = vld [vmem:[#allocation7 + $0x1a0] sm:$0xff]  ;;  %3096 = vmatprep.subr.mxu0 %v2348_v21  ;;  %3286 = vmatpush3.msra.mxu1 %v2447_v23  ;;  %v2443_v2 = vld [vmem:[#allocation7 + $0x48] sm:$0xff] }
 0x8c8   : > { %v2347_v8 = vld [vmem:[#allocation7 + $0x380] sm:$0xff]  ;;  %3097 = vmatpush3.msra.mxu0 %v2332_v10  ;;  %v2318_v6 = vld [vmem:[#allocation2] sm:$0x3]  ;;  %3287 = vmatprep.subr.mxu1 %v3815_v27  ;;  %v2442_v14 = vld [vmem:[#allocation7 + $0x28] sm:$0xff] }
 0x8c9   : > { %v2331_v5 = vld [vmem:[#allocation7 + $0x180] sm:$0xff]  ;;  %3098 = vmatprep.subr.mxu0 %v2347_v8  ;;  %v2360_v17 = vrot.slane %v2318_v6, %v2359_v25  ;;  %v2356_v32 = vrot.slane %v2318_v6, %v2355_v12  ;;  %3288 = vmatpush3.msra.mxu1 %v2446_v55  ;;  %v2441_v48 = vld [vmem:[#allocation7 + $0x8] sm:$0xff]  ;;  %v2617_v25 = vld [vmem:[#allocation7 + $0x18] sm:$0xff] }
 0x8ca   : > { %v2346_v41 = vld [vmem:[#allocation7 + $0x360] sm:$0xff]  ;;  %3099 = vmatpush3.msra.mxu0 %v2331_v5  ;;  %3289 = vmatprep.subr.mxu1 %v3815_v27 }
 0x8cb   : > { %v2330_v36 = vld [vmem:[#allocation7 + $0x160] sm:$0xff]  ;;  %3100 = vmatprep.subr.mxu0 %v2346_v41  ;;  %2427 = vmatprep.mubr.f32.mxu0 %v2360_v17 }
 0x8cc   : > { %v2345_v57 = vld [vmem:[#allocation7 + $0x340] sm:$0xff]  ;;  %3101 = vmatpush3.msra.mxu0 %v2330_v36  ;;  %3290 = vmatpush3.msra.mxu1 %v2445_v43  ;;  %v2618_v36 = vld [vmem:[#allocation7 + $0x38] sm:$0xff] }
 0x8cd   : > { %v2329_v60 = vld [vmem:[#allocation7 + $0x140] sm:$0xff]  ;;  %3102 = vmatprep.subr.mxu0 %v2345_v57  ;;  %3291 = vmatprep.subr.mxu1 %v3815_v27 }
 0x8ce   : > { %v2344_v29 = vld [vmem:[#allocation7 + $0x320] sm:$0xff]  ;;  %3103 = vmatpush3.msra.mxu0 %v2329_v60  ;;  %3292 = vmatpush3.msra.mxu1 %v2444_v46 }
 0x8cf   : > { %v2328_v50 = vld [vmem:[#allocation7 + $0x120] sm:$0xff]  ;;  %3104 = vmatprep.subr.mxu0 %v2344_v29  ;;  %3293 = vmatprep.subr.mxu1 %v3815_v27 }
 0x8d0   : > { %v2343_v13 = vld [vmem:[#allocation7 + $0x300] sm:$0xff]  ;;  %3105 = vmatpush3.msra.mxu0 %v2328_v50  ;;  %3294 = vmatpush3.msra.mxu1 %v2443_v2 }
 0x8d1   : > { %v2327_v31 = vld [vmem:[#allocation7 + $0x100] sm:$0xff]  ;;  %3106 = vmatprep.subr.mxu0 %v2343_v13  ;;  %3295 = vmatprep.subr.mxu1 %v3815_v27 }
 0x8d2   : > { %v2342_v28 = vld [vmem:[#allocation7 + $0x2e0] sm:$0xff]  ;;  %3107 = vmatpush3.msra.mxu0 %v2327_v31  ;;  %3296 = vmatpush3.msra.mxu1 %v2442_v14 }
 0x8d3   : > { %v2326_v56 = vld [vmem:[#allocation7 + $0xe0] sm:$0xff]  ;;  %3108 = vmatprep.subr.mxu0 %v2342_v28  ;;  %3297 = vmatprep.subr.mxu1 %v3815_v27 }
 0x8d4   : > { %v2341_v4 = vld [vmem:[#allocation7 + $0x2c0] sm:$0xff]  ;;  %3109 = vmatpush3.msra.mxu0 %v2326_v56  ;;  %3298 = vmatpush3.msra.mxu1 %v2441_v48 }
 0x8d5   : > { %v2325_v30 = vld [vmem:[#allocation7 + $0xc0] sm:$0xff]  ;;  %3110 = vmatprep.subr.mxu0 %v2341_v4  ;;  %3302 = vmatprep.subr.mxu1 %v3815_v27 }
 0x8d6   : > { %v2340_v63 = vld [vmem:[#allocation7 + $0x2a0] sm:$0xff]  ;;  %3111 = vmatpush3.msra.mxu0 %v2325_v30 }
 0x8d7   : > { %v2324_v54 = vld [vmem:[#allocation7 + $0xa0] sm:$0xff]  ;;  %3112 = vmatprep.subr.mxu0 %v2340_v63 }
 0x8d8   : > { %v2339_v11 = vld [vmem:[#allocation7 + $0x280] sm:$0xff]  ;;  %3113 = vmatpush3.msra.mxu0 %v2324_v54 }
 0x8d9   : > { %v2323_v3 = vld [vmem:[#allocation7 + $0x80] sm:$0xff]  ;;  %3114 = vmatprep.subr.mxu0 %v2339_v11 }
 0x8da   : > { %v2338_v52 = vld [vmem:[#allocation7 + $0x260] sm:$0xff]  ;;  %3115 = vmatpush3.msra.mxu0 %v2323_v3 }
 0x8db   : > { %v2322_v62 = vld [vmem:[#allocation7 + $0x60] sm:$0xff]  ;;  %3116 = vmatprep.subr.mxu0 %v2338_v52 }
 0x8dc   : > { %v2337_v38 = vld [vmem:[#allocation7 + $0x240] sm:$0xff]  ;;  %3117 = vmatpush3.msra.mxu0 %v2322_v62 }
 0x8dd   : > { %v2321_v19 = vld [vmem:[#allocation7 + $0x40] sm:$0xff]  ;;  %3118 = vmatprep.subr.mxu0 %v2337_v38 }
 0x8de   : > { %v2336_v37 = vld [vmem:[#allocation7 + $0x220] sm:$0xff]  ;;  %3119 = vmatpush3.msra.mxu0 %v2321_v19 }
 0x8df   : > { %v2320_v34 = vld [vmem:[#allocation7 + $0x20] sm:$0xff]  ;;  %3120 = vmatprep.subr.mxu0 %v2336_v37 }
 0x8e0   : > { %v2335_v26 = vld [vmem:[#allocation7 + $0x200] sm:$0xff]  ;;  %3121 = vmatpush3.msra.mxu0 %v2320_v34 }
 0x8e1   : > { %v2319_v33 = vld [vmem:[#allocation7] sm:$0xff]  ;;  %3122 = vmatprep.subr.mxu0 %v2335_v26 }
 0x8e2   : > { %3123 = vmatpush3.msra.mxu0 %v2319_v33  ;;  %v2351_v47 = vld [vmem:[#allocation8] sm:$0x1]  ;;  %v2449_v35 = vld [vmem:[#allocation8 + $0x1] sm:$0x1]  ;;  %v2535_v57 = vld [vmem:[#allocation8 + $0x2] sm:$0x1] }
 0x8e3   : > { %2428 = vmatmul.mubr.f32.vlgmr.msra.gmra.mxu0 %v2356_v32  ;;  %v2619_v30 = vld [vmem:[#allocation8 + $0x3] sm:$0x1] }
 0x9a3   : > { %v3124_v40 = vpop.f32.mrf.mxu0 }
 0x9a5   : > { %v3125_v45 = vpop.f32.mrf.mxu0 }
 0x9a6   : > { %v3126_v61 = vadd.f32 %v3125_v45, %v3124_v40 }
 0x9a8   : > { %v2430_v22 = vadd.f32 %v3126_v61, %v2351_v47 }
 0x9aa   : > { %v2434_v44 = vmin.f32 %v2430_v22, 0.0  ;;  %vm2433_vm8 = vcmp.gt.f32.partialorder %v2430_v22, 0.0 }
 0x9ac   : > { %v2435_v49 = vmul.f32 1.442695, %v2434_v44 }
 0x9ae   : > { %3601 = vpow2.f32 %v2435_v49 }
 0x9bb   : > { %v3602_v24 = vpop.eup %3601 }
 0x9bc   : > { %v2944_v18 = vadd.f32 -1.0, %v3602_v24 }
 0x9be   : > { %v2438_v16 = vmul.f32 1.6732632, %v2944_v18 }
 0x9c0   : > { %v2439_v42 = vsel %vm2433_vm8, %v2430_v22, %v2438_v16 }
 0x9c1   : > { %v2440_v53 = vmul.f32 1.050701, %v2439_v42 }
 0x9c3   : > { %3300 = vmatmul.mubr.msk.f32.vlgmr.msra.gmra.mxu1 %vm1049_vm11, %v2440_v53 }
 0x9c4   : > { %3310 = vmatprep.mubr.msk.f32.mxu1 %vm3816_vm7, %v3815_v27  ;;  %3303 = vmatpush3.msra.mxu1 %v2534_v9 }
 0x9c5   : > { %3304 = vmatprep.subr.mxu1 %v3815_v27 }
 0x9c6   : > { %3305 = vmatpush3.msra.mxu1 %v2533_v59 }
 0x9c7   : > { %3306 = vmatprep.subr.mxu1 %v3815_v27 }
 0x9c8   : > { %3307 = vmatpush3.msra.mxu1 %v2532_v20 }
 0x9c9   : > { %3308 = vmatprep.subr.mxu1 %v3815_v27 }
 0x9ca   : > { %3309 = vmatpush3.msra.mxu1 %v2531_v0 }
 0x9cb   : > { %3313 = vmatprep.subr.mxu1 %v3815_v27 }
 0xa83   : > { %v2519_v7 = vpop.f32.mrf.mxu1 }
 0xa84   : > { %v2520_v39 = vadd.f32 %v2519_v7, %v2449_v35 }
 0xa85   : > { %v3301_v1 = vpop.f32.mrf.mxu1 }
 0xa86   : > { %v2524_v15 = vmin.f32 %v2520_v39, 0.0  ;;  %vm2523_vm11 = vcmp.gt.f32.partialorder %v2520_v39, 0.0 }
 0xa88   : > { %v2525_v51 = vmul.f32 1.442695, %v2524_v15 }
 0xa8a   : > { %3603 = vpow2.f32 %v2525_v51 }
 0xa97   : > { %v3604_v21 = vpop.eup %3603 }
 0xa98   : > { %v2946_v10 = vadd.f32 -1.0, %v3604_v21 }
 0xa9a   : > { %v2528_v8 = vmul.f32 1.6732632, %v2946_v10 }
 0xa9c   : > { %v2529_v5 = vsel %vm2523_vm11, %v2520_v39, %v2528_v8 }
 0xa9d   : > { %v2530_v41 = vmul.f32 1.050701, %v2529_v5 }
 0xa9f   : > { %3311 = vmatmul.mubr.msk.f32.vlgmr.msra.gmra.mxu1 %vm695_vm6, %v2530_v41 }
 0xaa0   : > { %3317 = vmatprep.mubr.msk.f32.mxu1 %vm3816_vm7, %v3815_v27  ;;  %3314 = vmatpush3.msra.mxu1 %v2618_v36 }
 0xaa1   : > { %3315 = vmatprep.subr.mxu1 %v3815_v27 }
 0xaa2   : > { %3316 = vmatpush3.msra.mxu1 %v2617_v25 }
 0xb5f   : > { %v2605_v60 = vpop.f32.mrf.mxu1 }
 0xb60   : > { %v2606_v29 = vadd.f32 %v2605_v60, %v2535_v57 }
 0xb61   : > { %v3312_v6 = vpop.f32.mrf.mxu1 }
 0xb62   : > { %v2610_v50 = vmin.f32 %v2606_v29, 0.0  ;;  %vm2609_vm6 = vcmp.gt.f32.partialorder %v2606_v29, 0.0 }
 0xb64   : > { %v2611_v17 = vmul.f32 1.442695, %v2610_v50 }
 0xb66   : > { %3605 = vpow2.f32 %v2611_v17 }
 0xb73   : > { %v3606_v13 = vpop.eup %3605 }
 0xb74   : > { %v2948_v31 = vadd.f32 -1.0, %v3606_v13 }
 0xb76   : > { %v2614_v28 = vmul.f32 1.6732632, %v2948_v31 }
 0xb78   : > { %v2615_v56 = vsel %vm2609_vm6, %v2606_v29, %v2614_v28 }
 0xb79   : > { %v2616_v4 = vmul.f32 1.050701, %v2615_v56 }
 0xb7b   : > { %3318 = vmatmul.mubr.msk.f32.vlgmr.msra.gmra.mxu1 %vm509_vm3, %v2616_v4 }
 0xc3b   : > { %v2689_v63 = vpop.f32.mrf.mxu1 }
 0xc3c   : > { %v2690_v54 = vadd.f32 %v2689_v63, %v2619_v30 }
 0xc3d   : > { %v3319_v11 = vpop.f32.mrf.mxu1 }
 0xc3e   : > { %v2693_v3 = vsub.f32 0.0, %v2690_v54 }
 0xc40   : > { %v2694_v52 = vmul.f32 1.442695, %v2693_v3 }
 0xc42   : > { %3607 = vpow2.f32 %v2694_v52 }
 0xc4f   : > { %v3608_v62 = vpop.eup %3607 }
 0xc50   : > { %v2696_v38 = vadd.f32 1.0, %v3608_v62 }
 0xc52   : > { %3609 = vrcp.f32 %v2696_v38 }
 0xc5f   : > { %v3610_v19 = vpop.eup %3609 }
 0xc60   : > { %2700 = vst.msk [vmem:[%s354_s15] sm:$0x1] %vm2699_vm9, %v3610_v19 }
 0xc61 PF: > { %s21_s28 = sadd.s32 1, %s3791_s28   ;;  %s4690_s21 = smov %s3767_s22 }
 0xc62   : > { %p18_p7 = scmp.ge.s32.totalorder %s21_s28, 10   ;;  %s4691_s22 = smov %s3771_s23 }
 0xc63   : > { %s4692_s23 = smov %s3957_s19  ;;  %s4693_s24 = smov %s3783_s26 }
 0xc64   : > { %s4694_s25 = smov %s3787_s27  ;;  %s4695_s26 = smov %s4698_s13 }
 0xc65   : > { %s4696_s27 = smov %s4702_s17  ;;  %20 = sbr.rel (!%p18_p7) target bundleno = 10 (0xa), region = 107 }
 0xc6a   :  { %2718 = vsyncpa [#allocation4], 1 }
 0xc6b   :  { %2720 = vsyncpa [#allocation4 + $0x1], 1 }
 0xc6c   :  { %2721 = vsyncpa [#allocation6], 1 }
 0xc6d   :  { %2722 = vsyncpa [#allocation9], 1 }

</bundles_post_ra>
